<compile_context>
chip_gen: v7x
topology: tpu7x:2x2x1
jax: 0.10.0
libtpu: 0.0.40
codegen_flags: <defaults>
</compile_context>

<pallas_src>
from collections import namedtuple

import jax
import jax.numpy as jnp
from jax import lax
from jax.experimental import pallas as pl
from jax.experimental.pallas import tpu as pltpu

NEG = -1.0e30  # large-negative "log zero" (avoids -inf - -inf = nan)


def _round_up(x, m):
    return ((x + m - 1) // m) * m


# ----------------------------------------------------------------------------
# CTC forward (negative log likelihood) kernel — 8 batch rows per grid step
# ----------------------------------------------------------------------------
def _ctc_kernel(logits_ref,   # (T, BB, C)  input dtype (time-major block)
                ext_ref,      # (BB, L)     int32 extended labels [b, y1, b, y2, ...]
                valid_ref,    # (BB, L)     f32 1/0 : l < 2*S_b + 1
                allow2_ref,   # (BB, L)     f32 bias: 0 if skip-transition allowed else NEG
                final_ref,    # (BB, L)     f32 bias: 0 at positions {2S_b-1, 2S_b} else NEG
                tlen_ref,     # (BB, L)     int32 T_b broadcast along L
                out_ref,      # (BB, 128)   f32 per-batch nll (broadcast along lanes)
                emit_ref):    # (T, BB, L)  f32 scratch: log p(ext-label_l | t, b)
    T, BB, C = logits_ref.shape
    L = ext_ref.shape[1]

    # ---- log-softmax over the class axis for the whole block (VPU + EUP) ----
    logits = logits_ref[...].astype(jnp.float32)                     # (T, BB, C)
    mx = jnp.max(logits, axis=-1, keepdims=True)
    z = logits - mx
    logp = z - jnp.log(jnp.sum(jnp.exp(z), axis=-1, keepdims=True))  # (T, BB, C)

    # ---- emission gather: emit[t, b, l] = logp[t, b, ext[b, l]] --------------
    # one-hot matmul per batch row; hi/lo split keeps ~f32 accuracy with default
    # MXU precision (one-hot entries are exact in bf16).
    iota_c = lax.broadcasted_iota(jnp.int32, (C, L), 0)
    for b in range(BB):                                              # static unroll
        oh_b = (iota_c == ext_ref[pl.ds(b, 1), :]).astype(jnp.float32)   # (C, L)
        lp_b = logp[:, b, :]                                              # (T, C)
        hi = lp_b.astype(jnp.bfloat16).astype(jnp.float32)
        lo = lp_b - hi
        emit_b = (jnp.dot(hi, oh_b, preferred_element_type=jnp.float32)
                  + jnp.dot(lo, oh_b, preferred_element_type=jnp.float32))  # (T, L)
        emit_ref[:, pl.ds(b, 1), :] = emit_b[:, None, :]

    # ---- masks hoisted out of the DP loop -----------------------------------
    iota_l = lax.broadcasted_iota(jnp.int32, (1, L), 1)
    ge1_bias = jnp.where(iota_l >= 1, 0.0, NEG).astype(jnp.float32)  # no alpha[s-1] at s=0
    valid = valid_ref[...] > 0.5                                     # (BB, L) bool
    allow2_bias = allow2_ref[...]                                    # (BB, L)
    tlen = tlen_ref[...]                                             # (BB, L)

    emit0 = emit_ref[0]                                              # (BB, L)
    alpha0 = jnp.where(valid & (iota_l <= 1), emit0, NEG)

    # ---- alpha recursion: roll (XLU) + VPU/EUP only, vectorized over batch ----
    U = 4                                 # manual unroll factor inside fori_loop
    n_steps = T - 1
    n_chunks = (n_steps + U - 1) // U

    def chunk(k, alpha):
        base = 1 + k * U
        for j in range(U):                                           # static unroll
            t = base + j
            e_t = emit_ref[jnp.minimum(t, T - 1)]                    # (BB, L)
            a1 = pltpu.roll(alpha, 1, 1) + ge1_bias
            a2 = pltpu.roll(alpha, 2, 1) + allow2_bias
            m3 = jnp.maximum(jnp.maximum(alpha, a1), a2)
            lse = m3 + jnp.log(jnp.exp(alpha - m3) + jnp.exp(a1 - m3) + jnp.exp(a2 - m3))
            new = jnp.where(valid, lse + e_t, NEG)
            alpha = jnp.where(t < tlen, new, alpha)                  # freeze past T_b
        return alpha

    alpha = lax.fori_loop(0, n_chunks, chunk, alpha0)

    # ---- nll = -logsumexp(alpha at positions 2S_b, 2S_b - 1) -----------------
    masked = alpha + final_ref[...]
    m = jnp.max(masked, axis=-1, keepdims=True)                      # (BB, 1)
    ll = m + jnp.log(jnp.sum(jnp.exp(masked - m), axis=-1, keepdims=True))
    out_ref[...] = jnp.broadcast_to(-ll, out_ref.shape)


def ctc_loss_pallas(logits_TBC, input_lengths, targets, target_lengths,
                    L_ext=128, BB=8):
    """Per-batch CTC negative log likelihood (torch reduction='none' semantics)."""
    T, B, C = logits_TBC.shape
    S = targets.shape[1]
    assert 2 * S + 1 <= L_ext

    B_pad = _round_up(B, BB)
    pad_b = B_pad - B

    t_len = jnp.minimum(jnp.asarray(input_lengths, jnp.int32), T)
    tgt_len = jnp.asarray(target_lengths, jnp.int32)
    tgt = jnp.asarray(targets, jnp.int32)
    logits = logits_TBC
    if pad_b:
        logits = jnp.pad(logits, ((0, 0), (0, pad_b), (0, 0)))
        t_len = jnp.pad(t_len, (0, pad_b), constant_values=1)
        tgt_len = jnp.pad(tgt_len, (0, pad_b))
        tgt = jnp.pad(tgt, ((0, pad_b), (0, 0)))

    # ---- tiny host-side label/mask prep (replaces the old (B, C, 128) one-hot) ----
    l_iota = jnp.arange(L_ext, dtype=jnp.int32)[None, :]                 # (1, L)
    ext = jnp.zeros((B_pad, L_ext), jnp.int32).at[:, 1:2 * S:2].set(tgt)  # [b,y1,b,y2,...]
    two_s = 2 * tgt_len[:, None]                                          # (B_pad, 1)
    valid = l_iota < (two_s + 1)
    allow2 = (l_iota >= 2) & (ext != jnp.roll(ext, 2, axis=1))            # skip allowed
    final = (l_iota == two_s) | ((l_iota == two_s - 1) & (two_s > 0))

    valid_f = valid.astype(jnp.float32)
    allow2_bias = jnp.where(allow2, 0.0, NEG).astype(jnp.float32)
    final_bias = jnp.where(final, 0.0, NEG).astype(jnp.float32)
    tlen2d = jnp.broadcast_to(t_len[:, None], (B_pad, L_ext)).astype(jnp.int32)

    grid = (B_pad // BB,)
    out = pl.pallas_call(
        _ctc_kernel,
        out_shape=jax.ShapeDtypeStruct((B_pad, 128), jnp.float32),
        grid_spec=pltpu.PrefetchScalarGridSpec(
            num_scalar_prefetch=0,
            grid=grid,
            in_specs=[
                pl.BlockSpec((T, BB, C), lambda g: (0, g, 0)),   # time-major, no transpose
                pl.BlockSpec((BB, L_ext), lambda g: (g, 0)),
                pl.BlockSpec((BB, L_ext), lambda g: (g, 0)),
                pl.BlockSpec((BB, L_ext), lambda g: (g, 0)),
                pl.BlockSpec((BB, L_ext), lambda g: (g, 0)),
                pl.BlockSpec((BB, L_ext), lambda g: (g, 0)),
            ],
            out_specs=pl.BlockSpec((BB, 128), lambda g: (g, 0)),
            scratch_shapes=[pltpu.VMEM((T, BB, L_ext), jnp.float32)],
        ),
        compiler_params=pltpu.CompilerParams(dimension_semantics=("parallel",)),
    )(logits, ext, valid_f, allow2_bias, final_bias, tlen2d)
    return out[:B, 0]                                                  # (B,)


# ----------------------------------------------------------------------------
# Temperature knowledge-distillation (SeqKD) kernel — row-chunked partial sums
# ----------------------------------------------------------------------------
def _make_kd_kernel(inv_temp, use_blank):
    def kd_kernel(student_ref, teacher_ref, out_ref):
        s = student_ref[...].astype(jnp.float32) * inv_temp          # (BR, C)
        y = teacher_ref[...].astype(jnp.float32) * inv_temp
        if not use_blank:
            col = lax.broadcasted_iota(jnp.int32, s.shape, 1)
            blank = col == 0
            s = jnp.where(blank, NEG, s)                             # mask, no lane slice
            y = jnp.where(blank, NEG, y)

        sm = jnp.max(s, axis=-1, keepdims=True)
        s_logp = (s - sm) - jnp.log(jnp.sum(jnp.exp(s - sm), axis=-1, keepdims=True))
        ym = jnp.max(y, axis=-1, keepdims=True)
        y_logp = (y - ym) - jnp.log(jnp.sum(jnp.exp(y - ym), axis=-1, keepdims=True))
        y_p = jnp.exp(y_logp)

        kl_el = y_p * (y_logp - s_logp)
        if not use_blank:
            kl_el = jnp.where(blank, 0.0, kl_el)

        row = jnp.sum(kl_el, axis=-1, keepdims=True)                 # (BR, 1)
        tot = jnp.sum(row, axis=0, keepdims=True)                    # (1, 1)
        out_ref[...] = jnp.broadcast_to(tot[:, :, None], out_ref.shape)

    return kd_kernel


def seq_kd_pallas(student_TBC, teacher_TBC, temp, use_blank=False, block_rows=256):
    T, B, C = student_TBC.shape
    R = T * B
    s2 = student_TBC.reshape(R, C)
    y2 = teacher_TBC.reshape(R, C)

    BR = min(block_rows, _round_up(R, 8))
    R_pad = _round_up(R, BR)
    if R_pad != R:
        # zero-padded rows contribute exactly 0 to the KL sum (student == teacher)
        s2 = jnp.pad(s2, ((0, R_pad - R), (0, 0)))
        y2 = jnp.pad(y2, ((0, R_pad - R), (0, 0)))
    NC = R_pad // BR

    kernel = _make_kd_kernel(1.0 / float(temp), use_blank)
    out = pl.pallas_call(
        kernel,
        out_shape=jax.ShapeDtypeStruct((NC, 8, 128), jnp.float32),
        grid_spec=pltpu.PrefetchScalarGridSpec(
            num_scalar_prefetch=0,
            grid=(NC,),
            in_specs=[
                pl.BlockSpec((BR, C), lambda c: (c, 0)),
                pl.BlockSpec((BR, C), lambda c: (c, 0)),
            ],
            out_specs=pl.BlockSpec((1, 8, 128), lambda c: (c, 0, 0)),
        ),
        compiler_params=pltpu.CompilerParams(dimension_semantics=("parallel",)),
    )(s2, y2)
    kl_sum = jnp.sum(out[:, 0, 0])                                   # sum of per-chunk partials
    return kl_sum * (float(temp) ** 2) / float(R)                    # batchmean over T*B rows


# ----------------------------------------------------------------------------
# VACLoss module (mirrors the PyTorch interface)
# ----------------------------------------------------------------------------
EncoderOut = namedtuple("EncoderOut", ["out", "t_length"])
ModelOutputs = namedtuple("ModelOutputs", ["out", "t_length", "encoder_out"])


class VACLoss:
    def __init__(self, weights, temp):
        self.weights = tuple(float(w) for w in weights)
        self.temp = float(temp)

    def __call__(self, outputs, input, input_length, target, target_length):
        conv_out = outputs.encoder_out.out
        conv_length = outputs.encoder_out.t_length
        seq_out = outputs.out
        t_length = outputs.t_length
        return self._loss(conv_out, conv_length, seq_out, t_length, target, target_length)

    def _loss(self, conv_out, conv_length, seq_out, t_length, target, target_length):
        w = self.weights
        target = jnp.asarray(target, jnp.int32)
        target_length = jnp.asarray(target_length, jnp.int32)
        loss = jnp.float32(0.0)

        need_seq, need_conv = w[0] > 0.0, w[1] > 0.0
        if need_seq and need_conv and seq_out.shape == conv_out.shape:
            # fuse both CTC heads into one pallas_call by stacking along batch
            B = seq_out.shape[1]
            logits = jnp.concatenate([seq_out, conv_out], axis=1)          # (T, 2B, C)
            lens = jnp.concatenate([jnp.asarray(t_length, jnp.int32),
                                    jnp.asarray(conv_length, jnp.int32)], axis=0)
            tgt2 = jnp.concatenate([target, target], axis=0)
            tln2 = jnp.concatenate([target_length, target_length], axis=0)
            nll = ctc_loss_pallas(logits, lens, tgt2, tln2)                 # (2B,)
            loss = loss + w[0] * jnp.mean(nll[:B]) + w[1] * jnp.mean(nll[B:])
        else:
            if need_seq:
                loss = loss + w[0] * jnp.mean(
                    ctc_loss_pallas(seq_out, t_length, target, target_length))
            if need_conv:
                loss = loss + w[1] * jnp.mean(
                    ctc_loss_pallas(conv_out, conv_length, target, target_length))

        if w[2] > 0.0:
            loss = loss + w[2] * seq_kd_pallas(
                conv_out, jax.lax.stop_gradient(seq_out), self.temp, use_blank=False)
        return loss


if __name__ == "__main__":
    # small shapes: T=8 time steps, B=2 batch, C=16 classes (blank=0), S=5 max target length
    T, B, C, S = 8, 2, 16, 5
    key = jax.random.PRNGKey(0)
    k1, k2, k3, k4 = jax.random.split(key, 4)

    seq_out = jax.random.normal(k1, (T, B, C), dtype=jnp.float32)   # sequence-head logits
    conv_out = jax.random.normal(k2, (T, B, C), dtype=jnp.float32)  # conv-head logits
    target = jax.random.randint(k3, (B, S), 1, C, dtype=jnp.int32)  # labels in [1, C-1]
    target_length = jnp.array([3, 4], dtype=jnp.int32)
    t_length = jnp.array([8, 7], dtype=jnp.int32)
    conv_length = jnp.array([8, 7], dtype=jnp.int32)

    # `input` / `input_length` are unused by VACLoss.forward (kept for interface fidelity)
    dummy_input = jax.random.normal(k4, (B, 4, 16, 16), dtype=jnp.float32)
    dummy_input_length = jnp.array([16, 16], dtype=jnp.int32)

    outputs = ModelOutputs(
        out=seq_out,
        t_length=t_length,
        encoder_out=EncoderOut(out=conv_out, t_length=conv_length),
    )

    loss_fn = VACLoss(weights=(1.0, 1.0, 25.0), temp=8.0)
    loss = loss_fn(outputs, dummy_input, dummy_input_length, target, target_length)
    loss = jax.block_until_ready(loss)
    assert jnp.isfinite(loss), f"non-finite loss: {loss}"
    print("KERNEL_OK")
</pallas_src>

<mosaic_0001>
module attributes {stable_mosaic.version = 11 : i64} {
  func.func @_ctc_kernel(%arg0: i32, %arg1: memref<8x8x16xf32, #tpu.memory_space<vmem>>, %arg2: memref<8x128xi32, #tpu.memory_space<vmem>>, %arg3: memref<8x128xf32, #tpu.memory_space<vmem>>, %arg4: memref<8x128xf32, #tpu.memory_space<vmem>>, %arg5: memref<8x128xf32, #tpu.memory_space<vmem>>, %arg6: memref<8x128xi32, #tpu.memory_space<vmem>>, %arg7: memref<8x128xf32, #tpu.memory_space<vmem>>, %arg8: memref<8x8x128xf32, #tpu.memory_space<vmem>>) attributes {dimension_semantics = [#tpu.dimension_semantics<parallel>], iteration_bounds = array<i64: 1>, scalar_prefetch = 0 : i64, scratch_operands = 1 : i64, tpu.core_type = #tpu.core_type<tc>, window_params = [{transform_indices = @transform_0, window_bounds = array<i64: 8, 8, 16>}, {transform_indices = @transform_1, window_bounds = array<i64: 8, 128>}, {transform_indices = @transform_2, window_bounds = array<i64: 8, 128>}, {transform_indices = @transform_3, window_bounds = array<i64: 8, 128>}, {transform_indices = @transform_4, window_bounds = array<i64: 8, 128>}, {transform_indices = @transform_5, window_bounds = array<i64: 8, 128>}, {transform_indices = @transform_6, window_bounds = array<i64: 8, 128>}]} {
    %c0 = arith.constant 0 : index
    %c0_0 = arith.constant 0 : index
    %c0_1 = arith.constant 0 : index
    %0 = vector.load %arg1[%c0, %c0_0, %c0_1] : memref<8x8x16xf32, #tpu.memory_space<vmem>>, vector<8x8x16xf32>
    %cst = arith.constant dense<0xFF800000> : vector<8x8xf32>
    %1 = vector.multi_reduction <maximumf>, %0, %cst [2] : vector<8x8x16xf32> to vector<8x8xf32>
    %2 = vector.shape_cast %1 : vector<8x8xf32> to vector<8x8x1xf32>
    %3 = vector.broadcast %2 : vector<8x8x1xf32> to vector<8x8x16xf32>
    %4 = arith.subf %0, %3 : vector<8x8x16xf32>
    %5 = math.exp %4 : vector<8x8x16xf32>
    %cst_2 = arith.constant dense<0.000000e+00> : vector<8x8xf32>
    %6 = vector.multi_reduction <add>, %5, %cst_2 [2] : vector<8x8x16xf32> to vector<8x8xf32>
    %7 = vector.shape_cast %6 : vector<8x8xf32> to vector<8x8x1xf32>
    %8 = math.log %7 : vector<8x8x1xf32>
    %9 = vector.broadcast %8 : vector<8x8x1xf32> to vector<8x8x16xf32>
    %10 = arith.subf %4, %9 : vector<8x8x16xf32>
    %11 = tpu.iota {dimensions = array<i32: 0>} : vector<16x128xi32>
    %c0_3 = arith.constant 0 : index
    %c0_4 = arith.constant 0 : index
    %12 = vector.load %arg2[%c0_3, %c0_4] : memref<8x128xi32, #tpu.memory_space<vmem>>, vector<1x128xi32>
    %13 = vector.broadcast %12 : vector<1x128xi32> to vector<16x128xi32>
    %14 = arith.cmpi eq, %11, %13 : vector<16x128xi32>
    %15 = arith.extui %14 : vector<16x128xi1> to vector<16x128xi32>
    %16 = arith.sitofp %15 : vector<16x128xi32> to vector<16x128xf32>
    %17 = vector.extract_strided_slice %10 {offsets = [0, 0, 0], sizes = [8, 1, 16], strides = [1, 1, 1]} : vector<8x8x16xf32> to vector<8x1x16xf32>
    %18 = vector.shape_cast %17 : vector<8x1x16xf32> to vector<8x16xf32>
    %19 = arith.truncf %18 : vector<8x16xf32> to vector<8x16xbf16>
    %20 = arith.extf %19 : vector<8x16xbf16> to vector<8x16xf32>
    %21 = arith.subf %18, %20 : vector<8x16xf32>
    %cst_5 = arith.constant dense<0.000000e+00> : vector<8x128xf32>
    %22 = tpu.matmul %20, %16, %cst_5 {dimension_numbers = #tpu.dot_dimension_numbers<[1], [0], [0], [1], [0, 0, 1, 1], [], []>} : vector<8x16xf32>, vector<16x128xf32>, vector<8x128xf32> -> vector<8x128xf32>
    %cst_6 = arith.constant dense<0.000000e+00> : vector<8x128xf32>
    %23 = tpu.matmul %21, %16, %cst_6 {dimension_numbers = #tpu.dot_dimension_numbers<[1], [0], [0], [1], [0, 0, 1, 1], [], []>} : vector<8x16xf32>, vector<16x128xf32>, vector<8x128xf32> -> vector<8x128xf32>
    %24 = arith.addf %22, %23 : vector<8x128xf32>
    %25 = vector.shape_cast %24 : vector<8x128xf32> to vector<8x1x128xf32>
    %c0_7 = arith.constant 0 : index
    %c0_8 = arith.constant 0 : index
    %c0_9 = arith.constant 0 : index
    %26 = vector.load %arg8[%c0_7, %c0_8, %c0_9] : memref<8x8x128xf32, #tpu.memory_space<vmem>>, vector<8x1x128xf32>
    tpu.vector_store %arg8[%c0_7, %c0_8, %c0_9], %25 {strides = array<i32>} : memref<8x8x128xf32, #tpu.memory_space<vmem>>, vector<8x1x128xf32>,
    %c1 = arith.constant 1 : index
    %c0_10 = arith.constant 0 : index
    %27 = vector.load %arg2[%c1, %c0_10] : memref<8x128xi32, #tpu.memory_space<vmem>>, vector<1x128xi32>
    %28 = vector.broadcast %27 : vector<1x128xi32> to vector<16x128xi32>
    %29 = arith.cmpi eq, %11, %28 : vector<16x128xi32>
    %30 = arith.extui %29 : vector<16x128xi1> to vector<16x128xi32>
    %31 = arith.sitofp %30 : vector<16x128xi32> to vector<16x128xf32>
    %32 = vector.extract_strided_slice %10 {offsets = [0, 1, 0], sizes = [8, 1, 16], strides = [1, 1, 1]} : vector<8x8x16xf32> to vector<8x1x16xf32>
    %33 = vector.shape_cast %32 : vector<8x1x16xf32> to vector<8x16xf32>
    %34 = arith.truncf %33 : vector<8x16xf32> to vector<8x16xbf16>
    %35 = arith.extf %34 : vector<8x16xbf16> to vector<8x16xf32>
    %36 = arith.subf %33, %35 : vector<8x16xf32>
    %cst_11 = arith.constant dense<0.000000e+00> : vector<8x128xf32>
    %37 = tpu.matmul %35, %31, %cst_11 {dimension_numbers = #tpu.dot_dimension_numbers<[1], [0], [0], [1], [0, 0, 1, 1], [], []>} : vector<8x16xf32>, vector<16x128xf32>, vector<8x128xf32> -> vector<8x128xf32>
    %cst_12 = arith.constant dense<0.000000e+00> : vector<8x128xf32>
    %38 = tpu.matmul %36, %31, %cst_12 {dimension_numbers = #tpu.dot_dimension_numbers<[1], [0], [0], [1], [0, 0, 1, 1], [], []>} : vector<8x16xf32>, vector<16x128xf32>, vector<8x128xf32> -> vector<8x128xf32>
    %39 = arith.addf %37, %38 : vector<8x128xf32>
    %40 = vector.shape_cast %39 : vector<8x128xf32> to vector<8x1x128xf32>
    %c0_13 = arith.constant 0 : index
    %c1_14 = arith.constant 1 : index
    %c0_15 = arith.constant 0 : index
    %41 = vector.load %arg8[%c0_13, %c1_14, %c0_15] : memref<8x8x128xf32, #tpu.memory_space<vmem>>, vector<8x1x128xf32>
    tpu.vector_store %arg8[%c0_13, %c1_14, %c0_15], %40 {strides = array<i32>} : memref<8x8x128xf32, #tpu.memory_space<vmem>>, vector<8x1x128xf32>,
    %c2 = arith.constant 2 : index
    %c0_16 = arith.constant 0 : index
    %42 = vector.load %arg2[%c2, %c0_16] : memref<8x128xi32, #tpu.memory_space<vmem>>, vector<1x128xi32>
    %43 = vector.broadcast %42 : vector<1x128xi32> to vector<16x128xi32>
    %44 = arith.cmpi eq, %11, %43 : vector<16x128xi32>
    %45 = arith.extui %44 : vector<16x128xi1> to vector<16x128xi32>
    %46 = arith.sitofp %45 : vector<16x128xi32> to vector<16x128xf32>
    %47 = vector.extract_strided_slice %10 {offsets = [0, 2, 0], sizes = [8, 1, 16], strides = [1, 1, 1]} : vector<8x8x16xf32> to vector<8x1x16xf32>
    %48 = vector.shape_cast %47 : vector<8x1x16xf32> to vector<8x16xf32>
    %49 = arith.truncf %48 : vector<8x16xf32> to vector<8x16xbf16>
    %50 = arith.extf %49 : vector<8x16xbf16> to vector<8x16xf32>
    %51 = arith.subf %48, %50 : vector<8x16xf32>
    %cst_17 = arith.constant dense<0.000000e+00> : vector<8x128xf32>
    %52 = tpu.matmul %50, %46, %cst_17 {dimension_numbers = #tpu.dot_dimension_numbers<[1], [0], [0], [1], [0, 0, 1, 1], [], []>} : vector<8x16xf32>, vector<16x128xf32>, vector<8x128xf32> -> vector<8x128xf32>
    %cst_18 = arith.constant dense<0.000000e+00> : vector<8x128xf32>
    %53 = tpu.matmul %51, %46, %cst_18 {dimension_numbers = #tpu.dot_dimension_numbers<[1], [0], [0], [1], [0, 0, 1, 1], [], []>} : vector<8x16xf32>, vector<16x128xf32>, vector<8x128xf32> -> vector<8x128xf32>
    %54 = arith.addf %52, %53 : vector<8x128xf32>
    %55 = vector.shape_cast %54 : vector<8x128xf32> to vector<8x1x128xf32>
    %c0_19 = arith.constant 0 : index
    %c2_20 = arith.constant 2 : index
    %c0_21 = arith.constant 0 : index
    %56 = vector.load %arg8[%c0_19, %c2_20, %c0_21] : memref<8x8x128xf32, #tpu.memory_space<vmem>>, vector<8x1x128xf32>
    tpu.vector_store %arg8[%c0_19, %c2_20, %c0_21], %55 {strides = array<i32>} : memref<8x8x128xf32, #tpu.memory_space<vmem>>, vector<8x1x128xf32>,
    %c3 = arith.constant 3 : index
    %c0_22 = arith.constant 0 : index
    %57 = vector.load %arg2[%c3, %c0_22] : memref<8x128xi32, #tpu.memory_space<vmem>>, vector<1x128xi32>
    %58 = vector.broadcast %57 : vector<1x128xi32> to vector<16x128xi32>
    %59 = arith.cmpi eq, %11, %58 : vector<16x128xi32>
    %60 = arith.extui %59 : vector<16x128xi1> to vector<16x128xi32>
    %61 = arith.sitofp %60 : vector<16x128xi32> to vector<16x128xf32>
    %62 = vector.extract_strided_slice %10 {offsets = [0, 3, 0], sizes = [8, 1, 16], strides = [1, 1, 1]} : vector<8x8x16xf32> to vector<8x1x16xf32>
    %63 = vector.shape_cast %62 : vector<8x1x16xf32> to vector<8x16xf32>
    %64 = arith.truncf %63 : vector<8x16xf32> to vector<8x16xbf16>
    %65 = arith.extf %64 : vector<8x16xbf16> to vector<8x16xf32>
    %66 = arith.subf %63, %65 : vector<8x16xf32>
    %cst_23 = arith.constant dense<0.000000e+00> : vector<8x128xf32>
    %67 = tpu.matmul %65, %61, %cst_23 {dimension_numbers = #tpu.dot_dimension_numbers<[1], [0], [0], [1], [0, 0, 1, 1], [], []>} : vector<8x16xf32>, vector<16x128xf32>, vector<8x128xf32> -> vector<8x128xf32>
    %cst_24 = arith.constant dense<0.000000e+00> : vector<8x128xf32>
    %68 = tpu.matmul %66, %61, %cst_24 {dimension_numbers = #tpu.dot_dimension_numbers<[1], [0], [0], [1], [0, 0, 1, 1], [], []>} : vector<8x16xf32>, vector<16x128xf32>, vector<8x128xf32> -> vector<8x128xf32>
    %69 = arith.addf %67, %68 : vector<8x128xf32>
    %70 = vector.shape_cast %69 : vector<8x128xf32> to vector<8x1x128xf32>
    %c0_25 = arith.constant 0 : index
    %c3_26 = arith.constant 3 : index
    %c0_27 = arith.constant 0 : index
    %71 = vector.load %arg8[%c0_25, %c3_26, %c0_27] : memref<8x8x128xf32, #tpu.memory_space<vmem>>, vector<8x1x128xf32>
    tpu.vector_store %arg8[%c0_25, %c3_26, %c0_27], %70 {strides = array<i32>} : memref<8x8x128xf32, #tpu.memory_space<vmem>>, vector<8x1x128xf32>,
    %c4 = arith.constant 4 : index
    %c0_28 = arith.constant 0 : index
    %72 = vector.load %arg2[%c4, %c0_28] : memref<8x128xi32, #tpu.memory_space<vmem>>, vector<1x128xi32>
    %73 = vector.broadcast %72 : vector<1x128xi32> to vector<16x128xi32>
    %74 = arith.cmpi eq, %11, %73 : vector<16x128xi32>
    %75 = arith.extui %74 : vector<16x128xi1> to vector<16x128xi32>
    %76 = arith.sitofp %75 : vector<16x128xi32> to vector<16x128xf32>
    %77 = vector.extract_strided_slice %10 {offsets = [0, 4, 0], sizes = [8, 1, 16], strides = [1, 1, 1]} : vector<8x8x16xf32> to vector<8x1x16xf32>
    %78 = vector.shape_cast %77 : vector<8x1x16xf32> to vector<8x16xf32>
    %79 = arith.truncf %78 : vector<8x16xf32> to vector<8x16xbf16>
    %80 = arith.extf %79 : vector<8x16xbf16> to vector<8x16xf32>
    %81 = arith.subf %78, %80 : vector<8x16xf32>
    %cst_29 = arith.constant dense<0.000000e+00> : vector<8x128xf32>
    %82 = tpu.matmul %80, %76, %cst_29 {dimension_numbers = #tpu.dot_dimension_numbers<[1], [0], [0], [1], [0, 0, 1, 1], [], []>} : vector<8x16xf32>, vector<16x128xf32>, vector<8x128xf32> -> vector<8x128xf32>
    %cst_30 = arith.constant dense<0.000000e+00> : vector<8x128xf32>
    %83 = tpu.matmul %81, %76, %cst_30 {dimension_numbers = #tpu.dot_dimension_numbers<[1], [0], [0], [1], [0, 0, 1, 1], [], []>} : vector<8x16xf32>, vector<16x128xf32>, vector<8x128xf32> -> vector<8x128xf32>
    %84 = arith.addf %82, %83 : vector<8x128xf32>
    %85 = vector.shape_cast %84 : vector<8x128xf32> to vector<8x1x128xf32>
    %c0_31 = arith.constant 0 : index
    %c4_32 = arith.constant 4 : index
    %c0_33 = arith.constant 0 : index
    %86 = vector.load %arg8[%c0_31, %c4_32, %c0_33] : memref<8x8x128xf32, #tpu.memory_space<vmem>>, vector<8x1x128xf32>
    tpu.vector_store %arg8[%c0_31, %c4_32, %c0_33], %85 {strides = array<i32>} : memref<8x8x128xf32, #tpu.memory_space<vmem>>, vector<8x1x128xf32>,
    %c5 = arith.constant 5 : index
    %c0_34 = arith.constant 0 : index
    %87 = vector.load %arg2[%c5, %c0_34] : memref<8x128xi32, #tpu.memory_space<vmem>>, vector<1x128xi32>
    %88 = vector.broadcast %87 : vector<1x128xi32> to vector<16x128xi32>
    %89 = arith.cmpi eq, %11, %88 : vector<16x128xi32>
    %90 = arith.extui %89 : vector<16x128xi1> to vector<16x128xi32>
    %91 = arith.sitofp %90 : vector<16x128xi32> to vector<16x128xf32>
    %92 = vector.extract_strided_slice %10 {offsets = [0, 5, 0], sizes = [8, 1, 16], strides = [1, 1, 1]} : vector<8x8x16xf32> to vector<8x1x16xf32>
    %93 = vector.shape_cast %92 : vector<8x1x16xf32> to vector<8x16xf32>
    %94 = arith.truncf %93 : vector<8x16xf32> to vector<8x16xbf16>
    %95 = arith.extf %94 : vector<8x16xbf16> to vector<8x16xf32>
    %96 = arith.subf %93, %95 : vector<8x16xf32>
    %cst_35 = arith.constant dense<0.000000e+00> : vector<8x128xf32>
    %97 = tpu.matmul %95, %91, %cst_35 {dimension_numbers = #tpu.dot_dimension_numbers<[1], [0], [0], [1], [0, 0, 1, 1], [], []>} : vector<8x16xf32>, vector<16x128xf32>, vector<8x128xf32> -> vector<8x128xf32>
    %cst_36 = arith.constant dense<0.000000e+00> : vector<8x128xf32>
    %98 = tpu.matmul %96, %91, %cst_36 {dimension_numbers = #tpu.dot_dimension_numbers<[1], [0], [0], [1], [0, 0, 1, 1], [], []>} : vector<8x16xf32>, vector<16x128xf32>, vector<8x128xf32> -> vector<8x128xf32>
    %99 = arith.addf %97, %98 : vector<8x128xf32>
    %100 = vector.shape_cast %99 : vector<8x128xf32> to vector<8x1x128xf32>
    %c0_37 = arith.constant 0 : index
    %c5_38 = arith.constant 5 : index
    %c0_39 = arith.constant 0 : index
    %101 = vector.load %arg8[%c0_37, %c5_38, %c0_39] : memref<8x8x128xf32, #tpu.memory_space<vmem>>, vector<8x1x128xf32>
    tpu.vector_store %arg8[%c0_37, %c5_38, %c0_39], %100 {strides = array<i32>} : memref<8x8x128xf32, #tpu.memory_space<vmem>>, vector<8x1x128xf32>,
    %c6 = arith.constant 6 : index
    %c0_40 = arith.constant 0 : index
    %102 = vector.load %arg2[%c6, %c0_40] : memref<8x128xi32, #tpu.memory_space<vmem>>, vector<1x128xi32>
    %103 = vector.broadcast %102 : vector<1x128xi32> to vector<16x128xi32>
    %104 = arith.cmpi eq, %11, %103 : vector<16x128xi32>
    %105 = arith.extui %104 : vector<16x128xi1> to vector<16x128xi32>
    %106 = arith.sitofp %105 : vector<16x128xi32> to vector<16x128xf32>
    %107 = vector.extract_strided_slice %10 {offsets = [0, 6, 0], sizes = [8, 1, 16], strides = [1, 1, 1]} : vector<8x8x16xf32> to vector<8x1x16xf32>
    %108 = vector.shape_cast %107 : vector<8x1x16xf32> to vector<8x16xf32>
    %109 = arith.truncf %108 : vector<8x16xf32> to vector<8x16xbf16>
    %110 = arith.extf %109 : vector<8x16xbf16> to vector<8x16xf32>
    %111 = arith.subf %108, %110 : vector<8x16xf32>
    %cst_41 = arith.constant dense<0.000000e+00> : vector<8x128xf32>
    %112 = tpu.matmul %110, %106, %cst_41 {dimension_numbers = #tpu.dot_dimension_numbers<[1], [0], [0], [1], [0, 0, 1, 1], [], []>} : vector<8x16xf32>, vector<16x128xf32>, vector<8x128xf32> -> vector<8x128xf32>
    %cst_42 = arith.constant dense<0.000000e+00> : vector<8x128xf32>
    %113 = tpu.matmul %111, %106, %cst_42 {dimension_numbers = #tpu.dot_dimension_numbers<[1], [0], [0], [1], [0, 0, 1, 1], [], []>} : vector<8x16xf32>, vector<16x128xf32>, vector<8x128xf32> -> vector<8x128xf32>
    %114 = arith.addf %112, %113 : vector<8x128xf32>
    %115 = vector.shape_cast %114 : vector<8x128xf32> to vector<8x1x128xf32>
    %c0_43 = arith.constant 0 : index
    %c6_44 = arith.constant 6 : index
    %c0_45 = arith.constant 0 : index
    %116 = vector.load %arg8[%c0_43, %c6_44, %c0_45] : memref<8x8x128xf32, #tpu.memory_space<vmem>>, vector<8x1x128xf32>
    tpu.vector_store %arg8[%c0_43, %c6_44, %c0_45], %115 {strides = array<i32>} : memref<8x8x128xf32, #tpu.memory_space<vmem>>, vector<8x1x128xf32>,
    %c7 = arith.constant 7 : index
    %c0_46 = arith.constant 0 : index
    %117 = vector.load %arg2[%c7, %c0_46] : memref<8x128xi32, #tpu.memory_space<vmem>>, vector<1x128xi32>
    %118 = vector.broadcast %117 : vector<1x128xi32> to vector<16x128xi32>
    %119 = arith.cmpi eq, %11, %118 : vector<16x128xi32>
    %120 = arith.extui %119 : vector<16x128xi1> to vector<16x128xi32>
    %121 = arith.sitofp %120 : vector<16x128xi32> to vector<16x128xf32>
    %122 = vector.extract_strided_slice %10 {offsets = [0, 7, 0], sizes = [8, 1, 16], strides = [1, 1, 1]} : vector<8x8x16xf32> to vector<8x1x16xf32>
    %123 = vector.shape_cast %122 : vector<8x1x16xf32> to vector<8x16xf32>
    %124 = arith.truncf %123 : vector<8x16xf32> to vector<8x16xbf16>
    %125 = arith.extf %124 : vector<8x16xbf16> to vector<8x16xf32>
    %126 = arith.subf %123, %125 : vector<8x16xf32>
    %cst_47 = arith.constant dense<0.000000e+00> : vector<8x128xf32>
    %127 = tpu.matmul %125, %121, %cst_47 {dimension_numbers = #tpu.dot_dimension_numbers<[1], [0], [0], [1], [0, 0, 1, 1], [], []>} : vector<8x16xf32>, vector<16x128xf32>, vector<8x128xf32> -> vector<8x128xf32>
    %cst_48 = arith.constant dense<0.000000e+00> : vector<8x128xf32>
    %128 = tpu.matmul %126, %121, %cst_48 {dimension_numbers = #tpu.dot_dimension_numbers<[1], [0], [0], [1], [0, 0, 1, 1], [], []>} : vector<8x16xf32>, vector<16x128xf32>, vector<8x128xf32> -> vector<8x128xf32>
    %129 = arith.addf %127, %128 : vector<8x128xf32>
    %130 = vector.shape_cast %129 : vector<8x128xf32> to vector<8x1x128xf32>
    %c0_49 = arith.constant 0 : index
    %c7_50 = arith.constant 7 : index
    %c0_51 = arith.constant 0 : index
    %131 = vector.load %arg8[%c0_49, %c7_50, %c0_51] : memref<8x8x128xf32, #tpu.memory_space<vmem>>, vector<8x1x128xf32>
    tpu.vector_store %arg8[%c0_49, %c7_50, %c0_51], %130 {strides = array<i32>} : memref<8x8x128xf32, #tpu.memory_space<vmem>>, vector<8x1x128xf32>,
    %132 = tpu.iota {dimensions = array<i32: 1>} : vector<1x128xi32>
    %c1_i32 = arith.constant 1 : i32
    %133 = vector.broadcast %c1_i32 : i32 to vector<1x128xi32>
    %134 = arith.cmpi sge, %132, %133 : vector<1x128xi32>
    %cst_52 = arith.constant 0.000000e+00 : f32
    %cst_53 = arith.constant -1.000000e+30 : f32
    %135 = vector.broadcast %cst_52 : f32 to vector<1x128xf32>
    %136 = vector.broadcast %cst_53 : f32 to vector<1x128xf32>
    %137 = arith.select %134, %135, %136 : vector<1x128xi1>, vector<1x128xf32>
    %c0_54 = arith.constant 0 : index
    %c0_55 = arith.constant 0 : index
    %138 = vector.load %arg3[%c0_54, %c0_55] : memref<8x128xf32, #tpu.memory_space<vmem>>, vector<8x128xf32>
    %cst_56 = arith.constant 5.000000e-01 : f32
    %139 = vector.broadcast %cst_56 : f32 to vector<8x128xf32>
    %140 = arith.cmpf ogt, %138, %139 : vector<8x128xf32>
    %c0_57 = arith.constant 0 : index
    %c0_58 = arith.constant 0 : index
    %141 = vector.load %arg4[%c0_57, %c0_58] : memref<8x128xf32, #tpu.memory_space<vmem>>, vector<8x128xf32>
    %c0_59 = arith.constant 0 : index
    %c0_60 = arith.constant 0 : index
    %142 = vector.load %arg6[%c0_59, %c0_60] : memref<8x128xi32, #tpu.memory_space<vmem>>, vector<8x128xi32>
    %c0_61 = arith.constant 0 : index
    %c0_62 = arith.constant 0 : index
    %c0_63 = arith.constant 0 : index
    %143 = vector.load %arg8[%c0_61, %c0_62, %c0_63] : memref<8x8x128xf32, #tpu.memory_space<vmem>>, vector<1x8x128xf32>
    %144 = vector.shape_cast %143 : vector<1x8x128xf32> to vector<8x128xf32>
    %c1_i32_64 = arith.constant 1 : i32
    %145 = vector.broadcast %c1_i32_64 : i32 to vector<1x128xi32>
    %146 = arith.cmpi sle, %132, %145 : vector<1x128xi32>
    %147 = vector.broadcast %146 : vector<1x128xi1> to vector<8x128xi1>
    %148 = arith.andi %140, %147 : vector<8x128xi1>
    %cst_65 = arith.constant -1.000000e+30 : f32
    %149 = vector.broadcast %cst_65 : f32 to vector<8x128xf32>
    %150 = arith.select %148, %144, %149 : vector<8x128xi1>, vector<8x128xf32>
    %c0_i32 = arith.constant 0 : i32
    %c2_i32 = arith.constant 2 : i32
    %151 = arith.addi %c0_i32, %c2_i32 : i32
    %c1_i32_66 = arith.constant 1 : i32
    %152 = scf.for %arg9 = %c0_i32 to %151 step %c1_i32_66 iter_args(%arg10 = %150) -> (vector<8x128xf32>)  : i32 {
      %c4_i32 = arith.constant 4 : i32
      %169 = arith.muli %arg9, %c4_i32 : i32
      %c1_i32_75 = arith.constant 1 : i32
      %170 = arith.addi %c1_i32_75, %169 : i32
      %c0_i32_76 = arith.constant 0 : i32
      %171 = arith.addi %170, %c0_i32_76 : i32
      %c7_i32 = arith.constant 7 : i32
      %172 = arith.minsi %171, %c7_i32 : i32
      %173 = arith.index_cast %172 : i32 to index
      %c0_77 = arith.constant 0 : index
      %c0_78 = arith.constant 0 : index
      %174 = vector.load %arg8[%173, %c0_77, %c0_78] : memref<8x8x128xf32, #tpu.memory_space<vmem>>, vector<1x8x128xf32>
      %175 = vector.shape_cast %174 : vector<1x8x128xf32> to vector<8x128xf32>
      %c1_i32_79 = arith.constant 1 : i32
      %176 = tpu.dynamic_rotate %arg10 by %c1_i32_79 dim 1 : vector<8x128xf32>, i32 -> vector<8x128xf32>
      %177 = vector.broadcast %137 : vector<1x128xf32> to vector<8x128xf32>
      %178 = arith.addf %176, %177 : vector<8x128xf32>
      %c2_i32_80 = arith.constant 2 : i32
      %179 = tpu.dynamic_rotate %arg10 by %c2_i32_80 dim 1 : vector<8x128xf32>, i32 -> vector<8x128xf32>
      %180 = arith.addf %179, %141 : vector<8x128xf32>
      %181 = arith.maximumf %arg10, %178 : vector<8x128xf32>
      %182 = arith.maximumf %181, %180 : vector<8x128xf32>
      %183 = arith.subf %arg10, %182 : vector<8x128xf32>
      %184 = math.exp %183 : vector<8x128xf32>
      %185 = arith.subf %178, %182 : vector<8x128xf32>
      %186 = math.exp %185 : vector<8x128xf32>
      %187 = arith.addf %184, %186 : vector<8x128xf32>
      %188 = arith.subf %180, %182 : vector<8x128xf32>
      %189 = math.exp %188 : vector<8x128xf32>
      %190 = arith.addf %187, %189 : vector<8x128xf32>
      %191 = math.log %190 : vector<8x128xf32>
      %192 = arith.addf %182, %191 : vector<8x128xf32>
      %193 = arith.addf %192, %175 : vector<8x128xf32>
      %cst_81 = arith.constant -1.000000e+30 : f32
      %194 = vector.broadcast %cst_81 : f32 to vector<8x128xf32>
      %195 = arith.select %140, %193, %194 : vector<8x128xi1>, vector<8x128xf32>
      %196 = vector.broadcast %171 : i32 to vector<8x128xi32>
      %197 = arith.cmpi slt, %196, %142 : vector<8x128xi32>
      %198 = arith.select %197, %195, %arg10 : vector<8x128xi1>, vector<8x128xf32>
      %c1_i32_82 = arith.constant 1 : i32
      %199 = arith.addi %170, %c1_i32_82 : i32
      %c7_i32_83 = arith.constant 7 : i32
      %200 = arith.minsi %199, %c7_i32_83 : i32
      %201 = arith.index_cast %200 : i32 to index
      %c0_84 = arith.constant 0 : index
      %c0_85 = arith.constant 0 : index
      %202 = vector.load %arg8[%201, %c0_84, %c0_85] : memref<8x8x128xf32, #tpu.memory_space<vmem>>, vector<1x8x128xf32>
      %203 = vector.shape_cast %202 : vector<1x8x128xf32> to vector<8x128xf32>
      %c1_i32_86 = arith.constant 1 : i32
      %204 = tpu.dynamic_rotate %198 by %c1_i32_86 dim 1 : vector<8x128xf32>, i32 -> vector<8x128xf32>
      %205 = vector.broadcast %137 : vector<1x128xf32> to vector<8x128xf32>
      %206 = arith.addf %204, %205 : vector<8x128xf32>
      %c2_i32_87 = arith.constant 2 : i32
      %207 = tpu.dynamic_rotate %198 by %c2_i32_87 dim 1 : vector<8x128xf32>, i32 -> vector<8x128xf32>
      %208 = arith.addf %207, %141 : vector<8x128xf32>
      %209 = arith.maximumf %198, %206 : vector<8x128xf32>
      %210 = arith.maximumf %209, %208 : vector<8x128xf32>
      %211 = arith.subf %198, %210 : vector<8x128xf32>
      %212 = math.exp %211 : vector<8x128xf32>
      %213 = arith.subf %206, %210 : vector<8x128xf32>
      %214 = math.exp %213 : vector<8x128xf32>
      %215 = arith.addf %212, %214 : vector<8x128xf32>
      %216 = arith.subf %208, %210 : vector<8x128xf32>
      %217 = math.exp %216 : vector<8x128xf32>
      %218 = arith.addf %215, %217 : vector<8x128xf32>
      %219 = math.log %218 : vector<8x128xf32>
      %220 = arith.addf %210, %219 : vector<8x128xf32>
      %221 = arith.addf %220, %203 : vector<8x128xf32>
      %cst_88 = arith.constant -1.000000e+30 : f32
      %222 = vector.broadcast %cst_88 : f32 to vector<8x128xf32>
      %223 = arith.select %140, %221, %222 : vector<8x128xi1>, vector<8x128xf32>
      %224 = vector.broadcast %199 : i32 to vector<8x128xi32>
      %225 = arith.cmpi slt, %224, %142 : vector<8x128xi32>
      %226 = arith.select %225, %223, %198 : vector<8x128xi1>, vector<8x128xf32>
      %c2_i32_89 = arith.constant 2 : i32
      %227 = arith.addi %170, %c2_i32_89 : i32
      %c7_i32_90 = arith.constant 7 : i32
      %228 = arith.minsi %227, %c7_i32_90 : i32
      %229 = arith.index_cast %228 : i32 to index
      %c0_91 = arith.constant 0 : index
      %c0_92 = arith.constant 0 : index
      %230 = vector.load %arg8[%229, %c0_91, %c0_92] : memref<8x8x128xf32, #tpu.memory_space<vmem>>, vector<1x8x128xf32>
      %231 = vector.shape_cast %230 : vector<1x8x128xf32> to vector<8x128xf32>
      %c1_i32_93 = arith.constant 1 : i32
      %232 = tpu.dynamic_rotate %226 by %c1_i32_93 dim 1 : vector<8x128xf32>, i32 -> vector<8x128xf32>
      %233 = vector.broadcast %137 : vector<1x128xf32> to vector<8x128xf32>
      %234 = arith.addf %232, %233 : vector<8x128xf32>
      %c2_i32_94 = arith.constant 2 : i32
      %235 = tpu.dynamic_rotate %226 by %c2_i32_94 dim 1 : vector<8x128xf32>, i32 -> vector<8x128xf32>
      %236 = arith.addf %235, %141 : vector<8x128xf32>
      %237 = arith.maximumf %226, %234 : vector<8x128xf32>
      %238 = arith.maximumf %237, %236 : vector<8x128xf32>
      %239 = arith.subf %226, %238 : vector<8x128xf32>
      %240 = math.exp %239 : vector<8x128xf32>
      %241 = arith.subf %234, %238 : vector<8x128xf32>
      %242 = math.exp %241 : vector<8x128xf32>
      %243 = arith.addf %240, %242 : vector<8x128xf32>
      %244 = arith.subf %236, %238 : vector<8x128xf32>
      %245 = math.exp %244 : vector<8x128xf32>
      %246 = arith.addf %243, %245 : vector<8x128xf32>
      %247 = math.log %246 : vector<8x128xf32>
      %248 = arith.addf %238, %247 : vector<8x128xf32>
      %249 = arith.addf %248, %231 : vector<8x128xf32>
      %cst_95 = arith.constant -1.000000e+30 : f32
      %250 = vector.broadcast %cst_95 : f32 to vector<8x128xf32>
      %251 = arith.select %140, %249, %250 : vector<8x128xi1>, vector<8x128xf32>
      %252 = vector.broadcast %227 : i32 to vector<8x128xi32>
      %253 = arith.cmpi slt, %252, %142 : vector<8x128xi32>
      %254 = arith.select %253, %251, %226 : vector<8x128xi1>, vector<8x128xf32>
      %c3_i32 = arith.constant 3 : i32
      %255 = arith.addi %170, %c3_i32 : i32
      %c7_i32_96 = arith.constant 7 : i32
      %256 = arith.minsi %255, %c7_i32_96 : i32
      %257 = arith.index_cast %256 : i32 to index
      %c0_97 = arith.constant 0 : index
      %c0_98 = arith.constant 0 : index
      %258 = vector.load %arg8[%257, %c0_97, %c0_98] : memref<8x8x128xf32, #tpu.memory_space<vmem>>, vector<1x8x128xf32>
      %259 = vector.shape_cast %258 : vector<1x8x128xf32> to vector<8x128xf32>
      %c1_i32_99 = arith.constant 1 : i32
      %260 = tpu.dynamic_rotate %254 by %c1_i32_99 dim 1 : vector<8x128xf32>, i32 -> vector<8x128xf32>
      %261 = vector.broadcast %137 : vector<1x128xf32> to vector<8x128xf32>
      %262 = arith.addf %260, %261 : vector<8x128xf32>
      %c2_i32_100 = arith.constant 2 : i32
      %263 = tpu.dynamic_rotate %254 by %c2_i32_100 dim 1 : vector<8x128xf32>, i32 -> vector<8x128xf32>
      %264 = arith.addf %263, %141 : vector<8x128xf32>
      %265 = arith.maximumf %254, %262 : vector<8x128xf32>
      %266 = arith.maximumf %265, %264 : vector<8x128xf32>
      %267 = arith.subf %254, %266 : vector<8x128xf32>
      %268 = math.exp %267 : vector<8x128xf32>
      %269 = arith.subf %262, %266 : vector<8x128xf32>
      %270 = math.exp %269 : vector<8x128xf32>
      %271 = arith.addf %268, %270 : vector<8x128xf32>
      %272 = arith.subf %264, %266 : vector<8x128xf32>
      %273 = math.exp %272 : vector<8x128xf32>
      %274 = arith.addf %271, %273 : vector<8x128xf32>
      %275 = math.log %274 : vector<8x128xf32>
      %276 = arith.addf %266, %275 : vector<8x128xf32>
      %277 = arith.addf %276, %259 : vector<8x128xf32>
      %cst_101 = arith.constant -1.000000e+30 : f32
      %278 = vector.broadcast %cst_101 : f32 to vector<8x128xf32>
      %279 = arith.select %140, %277, %278 : vector<8x128xi1>, vector<8x128xf32>
      %280 = vector.broadcast %255 : i32 to vector<8x128xi32>
      %281 = arith.cmpi slt, %280, %142 : vector<8x128xi32>
      %282 = arith.select %281, %279, %254 : vector<8x128xi1>, vector<8x128xf32>
      scf.yield %282 : vector<8x128xf32>
    }
    %c2_i32_67 = arith.constant 2 : i32
    %c0_68 = arith.constant 0 : index
    %c0_69 = arith.constant 0 : index
    %153 = vector.load %arg5[%c0_68, %c0_69] : memref<8x128xf32, #tpu.memory_space<vmem>>, vector<8x128xf32>
    %154 = arith.addf %152, %153 : vector<8x128xf32>
    %cst_70 = arith.constant dense<0xFF800000> : vector<8xf32>
    %155 = vector.multi_reduction <maximumf>, %154, %cst_70 [1] : vector<8x128xf32> to vector<8xf32>
    %156 = vector.shape_cast %155 : vector<8xf32> to vector<8x1xf32>
    %157 = vector.broadcast %156 : vector<8x1xf32> to vector<8x128xf32>
    %158 = arith.subf %154, %157 : vector<8x128xf32>
    %159 = math.exp %158 : vector<8x128xf32>
    %cst_71 = arith.constant dense<0.000000e+00> : vector<8xf32>
    %160 = vector.multi_reduction <add>, %159, %cst_71 [1] : vector<8x128xf32> to vector<8xf32>
    %161 = vector.shape_cast %160 : vector<8xf32> to vector<8x1xf32>
    %162 = math.log %161 : vector<8x1xf32>
    %163 = arith.addf %156, %162 : vector<8x1xf32>
    %cst_72 = arith.constant 0.000000e+00 : f32
    %164 = vector.broadcast %cst_72 : f32 to vector<8x1xf32>
    %165 = arith.subf %164, %163 : vector<8x1xf32>
    %166 = vector.shape_cast %165 : vector<8x1xf32> to vector<8x1xf32>
    %167 = vector.broadcast %166 : vector<8x1xf32> to vector<8x128xf32>
    %c0_73 = arith.constant 0 : index
    %c0_74 = arith.constant 0 : index
    %168 = vector.load %arg7[%c0_73, %c0_74] : memref<8x128xf32, #tpu.memory_space<vmem>>, vector<8x128xf32>
    tpu.vector_store %arg7[%c0_73, %c0_74], %167 {strides = array<i32>} : memref<8x128xf32, #tpu.memory_space<vmem>>, vector<8x128xf32>,
    return
  }
  func.func @transform_0(%arg0: i32) -> (i32, i32, i32) {
    %c0_i32 = arith.constant 0 : i32
    %c0_i32_0 = arith.constant 0 : i32
    %c0_i32_1 = arith.constant 0 : i32
    return %c0_i32, %arg0, %c0_i32_0 : i32, i32, i32
  }
  func.func @transform_1(%arg0: i32) -> (i32, i32) {
    %c0_i32 = arith.constant 0 : i32
    %c0_i32_0 = arith.constant 0 : i32
    return %arg0, %c0_i32 : i32, i32
  }
  func.func @transform_2(%arg0: i32) -> (i32, i32) {
    %c0_i32 = arith.constant 0 : i32
    %c0_i32_0 = arith.constant 0 : i32
    return %arg0, %c0_i32 : i32, i32
  }
  func.func @transform_3(%arg0: i32) -> (i32, i32) {
    %c0_i32 = arith.constant 0 : i32
    %c0_i32_0 = arith.constant 0 : i32
    return %arg0, %c0_i32 : i32, i32
  }
  func.func @transform_4(%arg0: i32) -> (i32, i32) {
    %c0_i32 = arith.constant 0 : i32
    %c0_i32_0 = arith.constant 0 : i32
    return %arg0, %c0_i32 : i32, i32
  }
  func.func @transform_5(%arg0: i32) -> (i32, i32) {
    %c0_i32 = arith.constant 0 : i32
    %c0_i32_0 = arith.constant 0 : i32
    return %arg0, %c0_i32 : i32, i32
  }
  func.func @transform_6(%arg0: i32) -> (i32, i32) {
    %c0_i32 = arith.constant 0 : i32
    %c0_i32_0 = arith.constant 0 : i32
    return %arg0, %c0_i32 : i32, i32
  }
}

</mosaic_0001>

<bundles_post_ra>
// kernel: tpu_custom_call.1
= control target key start
LH: loop header
LB: loop body
LE: loop exit
PB: predicated region body
PF: predicated region fallthrough
CT: control target
= control target key end

     0   :  { %11 = vsyncpa [#allocation4], 0  ;;  %s3721_s0 = inlined_call_operand.hbm [shape: f32[8,8,16], index: 0, kind: input, shape index: {}]   ;;  %s3722_s1 = inlined_call_operand.hbm [shape: s32[8,128], index: 1, kind: input, shape index: {}]   ;;  %s3723_s2 = inlined_call_operand.hbm [shape: f32[8,128], index: 2, kind: input, shape index: {}]   ;;  %s3724_s3 = inlined_call_operand.vmem [shape: f32[8,128], index: 3, kind: input, shape index: {}]   ;;  %s3725_s4 = inlined_call_operand.hbm [shape: f32[8,128], index: 4, kind: input, shape index: {}]   ;;  %s3726_s5 = inlined_call_operand.vmem [shape: s32[8,128], index: 5, kind: input, shape index: {}]   ;;  %s3727_s6 = inlined_call_operand.hbm [shape: f32[8,128], index: 6, kind: output, shape index: {}]  }
   0x1   :  { %12 = vsyncpa [#allocation7], 0 }
   0x2   :  { %13 = vsyncpa [#allocation10], 0 }
   0x3   :  { %14 = vsyncpa [#allocation5], 0  ;;  %s2987_s21 = smov [#allocation6]   ;;  %s2988_s23 = smov [#allocation3]  }
   0x4   :  { %s33_s22 = sshll.u32 %s2987_s21, 4  ;;  %s20_s24 = sshll.u32 %s2988_s23, 4  ;;  %s34_s22 = int_to_ptr.vmem [resolvable:$true] %s33_s22  ;;  %s3037_s24 = int_to_ptr.vmem [resolvable:$true] %s20_s24 }
   0x5   :  { %s2853_s27 = scalar_lea.hbm %s3722_s1, 128 }
   0x6   :  { %p2854_p0 = scmp.ne.s32.totalorder %s3722_s1, %s2853_s27  ;;  %p2857_p1 = scmp.lt.u32.totalorder %s2853_s27, %s3722_s1 }
   0x8   :  { %p2859_p2 = pnand %p2857_p1, %p2854_p0 }
   0xa   :  { %2862 = shalt.err (!%p2859_p2)
}
   0xb   :  { %s2863_s8 = scalar_lea.vmem %s34_s22, 128  ;;  %p2868_p4 = scmp.lt.s32.totalorder %s34_s22, %s34_s22 }
   0xc   :  { %p2864_p3 = scmp.ne.s32.totalorder %s34_s22, %s2863_s8  ;;  %p2869_p5 = scmp.lt.s32.totalorder %s2863_s8, %s2863_s8 }
   0xe   :  { %p2870_p6 = por %p2869_p5, %p2868_p4 }
  0x10   :  { %p2871_p7 = pnand %p2870_p6, %p2864_p3 }
  0x12   :  { %2874 = shalt.err (!%p2871_p7)
}
  0x13   :  { %36 = dma.hbm_to_vmem [thread:$0]  %s3722_s1, 128, %s34_s22, [#allocation7]  }
  0x14   :  { %s2875_s13 = scalar_lea.hbm %s3721_s0, 1024 }
  0x15   :  { %p2876_p8 = scmp.ne.s32.totalorder %s3721_s0, %s2875_s13  ;;  %p2879_p9 = scmp.lt.u32.totalorder %s2875_s13, %s3721_s0 }
  0x17   :  { %p2881_p10 = pnand %p2879_p9, %p2876_p8 }
  0x19   :  { %2884 = shalt.err (!%p2881_p10)
}
  0x1a   :  { %s2885_s18 = scalar_lea.vmem %s3037_s24, 1024  ;;  %p2890_p12 = scmp.lt.s32.totalorder %s3037_s24, %s3037_s24 }
  0x1b   :  { %p2886_p11 = scmp.ne.s32.totalorder %s3037_s24, %s2885_s18  ;;  %p2891_p13 = scmp.lt.s32.totalorder %s2885_s18, %s2885_s18 }
  0x1d   :  { %p2892_p0 = por %p2891_p13, %p2890_p12 }
  0x1f   :  { %p2893_p1 = pnand %p2892_p0, %p2886_p11 }
  0x21   :  { %2896 = shalt.err (!%p2893_p1)
}
  0x22   :  { %s2989_s1 = smov 128   ;;  %s2990_s19 = smov 8  }
  0x23   :  { %26 = dma.hbm_to_vmem [thread:$0]  %s3721_s0, 1024, %s3037_s24, [#allocation4], %s2989_s1, %s2989_s1, %s2990_s19  }
  0x24   :  { %s2991_s22 = smov [#allocation8]   ;;  %s2992_s25 = smov [#allocation9]  }
  0x25   :  { %s43_s23 = sshll.u32 %s2991_s22, 4  ;;  %s55_s26 = sshll.u32 %s2992_s25, 4  ;;  %s44_s23 = int_to_ptr.vmem [resolvable:$true] %s43_s23  ;;  %s56_s26 = int_to_ptr.vmem [resolvable:$true] %s55_s26 }
  0x26   :  { %s2897_s29 = scalar_lea.hbm %s3723_s2, 128 }
  0x27   :  { %p2898_p2 = scmp.ne.s32.totalorder %s3723_s2, %s2897_s29  ;;  %p2901_p3 = scmp.lt.u32.totalorder %s2897_s29, %s3723_s2 }
  0x29   :  { %p2903_p4 = pnand %p2901_p3, %p2898_p2 }
  0x2b   :  { %2906 = shalt.err (!%p2903_p4)
}
  0x2c   :  { %s2907_s0 = scalar_lea.vmem %s44_s23, 128  ;;  %p2912_p6 = scmp.lt.s32.totalorder %s44_s23, %s44_s23 }
  0x2d   :  { %p2908_p5 = scmp.ne.s32.totalorder %s44_s23, %s2907_s0  ;;  %p2913_p7 = scmp.lt.s32.totalorder %s2907_s0, %s2907_s0 }
  0x2f   :  { %p2914_p8 = por %p2913_p7, %p2912_p6 }
  0x31   :  { %p2915_p9 = pnand %p2914_p8, %p2908_p5 }
  0x33   :  { %2918 = shalt.err (!%p2915_p9)
}
  0x34   :  { %46 = dma.hbm_to_vmem [thread:$0]  %s3723_s2, 128, %s44_s23, [#allocation7]  }
  0x35   :  { %s2919_s13 = scalar_lea.hbm %s3725_s4, 128 }
  0x36   :  { %p2920_p10 = scmp.ne.s32.totalorder %s3725_s4, %s2919_s13  ;;  %p2923_p11 = scmp.lt.u32.totalorder %s2919_s13, %s3725_s4 }
  0x38   :  { %p2925_p12 = pnand %p2923_p11, %p2920_p10 }
  0x3a   :  { %2928 = shalt.err (!%p2925_p12)
}
  0x3b   :  { %s2929_s18 = scalar_lea.vmem %s56_s26, 128  ;;  %p2934_p0 = scmp.lt.s32.totalorder %s56_s26, %s56_s26 }
  0x3c   :  { %p2930_p13 = scmp.ne.s32.totalorder %s56_s26, %s2929_s18  ;;  %p2935_p1 = scmp.lt.s32.totalorder %s2929_s18, %s2929_s18 }
  0x3e   :  { %p2936_p2 = por %p2935_p1, %p2934_p0 }
  0x40   :  { %p2937_p3 = pnand %p2936_p2, %p2930_p13 }
  0x42   :  { %2940 = shalt.err (!%p2937_p3)
}
  0x43   :  { %58 = dma.hbm_to_vmem [thread:$0]  %s3725_s4, 128, %s56_s26, [#allocation10]  }
  0x44   :  { %2971 = dma.done.wait [#allocation4], 1024  }
  0x45   :  { %2972 = vsyncadd [#allocation4], 4294966272 }
  0x46   :  { %2973 = dma.done.wait [#allocation7], 256  }
  0x47   :  { %2974 = vsyncadd [#allocation7], 4294967040 }
  0x48   :  { %2975 = dma.done.wait [#allocation10], 128  }
  0x49   :  { %2976 = vsyncadd [#allocation10], 4294967168  ;;  %vm3730_vm0 = vcmask 130048   ;;  %v3095_v0 = vld [vmem:[%s3724_s3] sm:$0xff]  ;;  %v75_v4 = vld [vmem:[#allocation3 + $0x10] sm:$0xff]  ;;  %v178_v58 = vlaneseq  ;;  %v2993_v62 = vmov 0.0|0.0  }
  0x4a   :  { %v3100_v1 = vld [vmem:[%s3726_s5] sm:$0xff]  ;;  %v74_v5 = vld [vmem:[#allocation3 + $0x8] sm:$0xff]  ;;  %v76_v6 = vld [vmem:[#allocation3 + $0x18] sm:$0xff]  ;;  %v88_v7 = vsel %vm3730_vm0, %v75_v4, -inf  ;;  %2690 = vmatprep.subr.bf16.mxu0 %v2993_v62  ;;  %2696 = vmatprep.subr.bf16.mxu1 %v2993_v62  ;;  %vm3728_vm6 = vmmov 0   ;;  %s3663_s3 = smov 0  }
  0x4b   :  { %v73_v2 = vld [vmem:[#allocation3] sm:$0xff]  ;;  %89 = vmax.xlane.f32.xlu1 %v88_v7  ;;  %v85_v8 = vsel %vm3730_vm0, %v74_v5, -inf  ;;  %v91_v9 = vsel %vm3730_vm0, %v76_v6, -inf  ;;  %v78_v11 = vld [vmem:[#allocation3 + $0x28] sm:$0xff]  ;;  %v79_v14 = vld [vmem:[#allocation3 + $0x30] sm:$0xff]  ;;  %v3143_v59 = vshrl.u32 %v178_v58, 7 }
  0x4c   :  { %v82_v3 = vsel %vm3730_vm0, %v73_v2, -inf  ;;  %v77_v10 = vld [vmem:[#allocation3 + $0x20] sm:$0xff]  ;;  %v97_v13 = vsel %vm3730_vm0, %v78_v11, -inf  ;;  %v80_v15 = vld [vmem:[#allocation3 + $0x38] sm:$0xff]  ;;  %v100_v16 = vsel %vm3730_vm0, %v79_v14, -inf }
  0x4d   :  { %83 = vmax.xlane.f32.xlu0 %v82_v3  ;;  %v94_v12 = vsel %vm3730_vm0, %v77_v10, -inf  ;;  %v103_v17 = vsel %vm3730_vm0, %v80_v15, -inf  ;;  %v180_v60 = vadd.s32 8, %v3143_v59  ;;  %v2421_v61 = vld [vmem:[#allocation6] ss:$0 sm:$0xff]  ;;  %v2995_v3 = vmov 0.0  }
  0x4e   :  { %vm186_vm1 = vcmp.eq.s32.totalorder %v3143_v59, %v2421_v61  ;;  %v2434_v63 = vld [vmem:[#allocation6 + $0x1] ss:$0 sm:$0xff]  ;;  %2582 = vmatprep.mubr.msk.f32.mxu0 %vm3728_vm6, %v2995_v3  ;;  %2596 = vmatprep.mubr.msk.f32.mxu1 %vm3728_vm6, %v2995_v3  ;;  %v2460_v7 = vld [vmem:[#allocation6 + $0x3] ss:$0 sm:$0xff] }
  0x4f   :  { %92 = vmax.xlane.f32.xlu1 %v91_v9  ;;  %vm187_vm2 = vcmp.eq.s32.totalorder %v180_v60, %v2421_v61  ;;  %vm482_vm4 = vcmp.eq.s32.totalorder %v3143_v59, %v2434_v63  ;;  %vm483_vm5 = vcmp.eq.s32.totalorder %v180_v60, %v2434_v63  ;;  %vm980_vm11 = vcmp.eq.s32.totalorder %v3143_v59, %v2460_v7 }
  0x50   :  { %vm3149_vm3 = vmpackc.low %vm187_vm2, %vm186_vm1  ;;  %vm981_vm12 = vcmp.eq.s32.totalorder %v180_v60, %v2460_v7 }
  0x51   :  { %86 = vmax.xlane.f32.xlu0 %v85_v8  ;;  %vm3161_vm7 = vmpackc.low %vm483_vm5, %vm482_vm4 }
  0x52   :  { %vm3176_vm13 = vmpackc.low %vm981_vm12, %vm980_vm11 }
  0x53   :  { %98 = vmax.xlane.f32.xlu1 %v97_v13 }
  0x55   :  { %95 = vmax.xlane.f32.xlu0 %v94_v12 }
  0x57   :  { %104 = vmax.xlane.f32.xlu1 %v103_v17 }
  0x59   :  { %101 = vmax.xlane.f32.xlu0 %v100_v16 }
  0xd8   :  { %v90_v20 = vpop.xlane.xlu1 %89 }
  0xd9   :  { %v3112_v21 = vsub.f32 %v75_v4, %v90_v20  ;;  %v2996_v4 = vmov 1.0|1.0  }
  0xda   :  { %v84_v18 = vpop.xlane.xlu0 %83  ;;  %2692 = vmatpush3.bf16.msk.msra.mxu0 %vm3149_vm3, %v2996_v4  ;;  %2698 = vmatpush3.bf16.msk.msra.mxu1 %vm3161_vm7, %v2996_v4 }
  0xdb   :  { %v3110_v19 = vsub.f32 %v73_v2, %v84_v18  ;;  %v118_v23 = vmul.f32 1.442695, %v3112_v21  ;;  %2693 = vmatprep.subr.bf16.mxu0 %v2993_v62  ;;  %2699 = vmatprep.subr.bf16.mxu1 %v2993_v62 }
  0xdc   :  { %v93_v26 = vpop.xlane.xlu1 %92 }
  0xdd   :  { %v114_v22 = vmul.f32 1.442695, %v3110_v19  ;;  %v3118_v27 = vsub.f32 %v76_v6, %v93_v26  ;;  %v2447_v6 = vld [vmem:[#allocation6 + $0x2] ss:$0 sm:$0xff] }
  0xde   :  { %v87_v24 = vpop.xlane.xlu0 %86  ;;  %vm731_vm8 = vcmp.eq.s32.totalorder %v3143_v59, %v2447_v6  ;;  %vm732_vm9 = vcmp.eq.s32.totalorder %v180_v60, %v2447_v6 }
  0xdf   :  { %2785 = vpow2.f32 %v114_v22  ;;  %v3116_v25 = vsub.f32 %v74_v5, %v87_v24  ;;  %v120_v29 = vmul.f32 1.442695, %v3118_v27  ;;  %vm3171_vm10 = vmpackc.low %vm732_vm9, %vm731_vm8 }
  0xe0   :  { %2787 = vpow2.f32 %v118_v23  ;;  %v99_v32 = vpop.xlane.xlu1 %98 }
  0xe1   :  { %v116_v28 = vmul.f32 1.442695, %v3116_v25  ;;  %v3124_v33 = vsub.f32 %v78_v11, %v99_v32  ;;  %v2486_v11 = vld [vmem:[#allocation6 + $0x5] ss:$0 sm:$0xff] }
  0xe2   :  { %v96_v30 = vpop.xlane.xlu0 %95  ;;  %vm1478_vm2 = vcmp.eq.s32.totalorder %v3143_v59, %v2486_v11  ;;  %vm1479_vm4 = vcmp.eq.s32.totalorder %v180_v60, %v2486_v11 }
  0xe3   :  { %2789 = vpow2.f32 %v116_v28  ;;  %v3122_v31 = vsub.f32 %v77_v10, %v96_v30  ;;  %v124_v35 = vmul.f32 1.442695, %v3124_v33  ;;  %v2473_v10 = vld [vmem:[#allocation6 + $0x4] ss:$0 sm:$0xff]  ;;  %vm3186_vm5 = vmpackc.low %vm1479_vm4, %vm1478_vm2  ;;  %vm228_vm2 = vcmask 1042434  }
  0xe4   :  { %2791 = vpow2.f32 %v120_v29  ;;  %v105_v38 = vpop.xlane.xlu1 %104  ;;  %vm1229_vm14 = vcmp.eq.s32.totalorder %v3143_v59, %v2473_v10  ;;  %vm1230_vm15 = vcmp.eq.s32.totalorder %v180_v60, %v2473_v10  ;;  %vm231_vm4 = vcmask 1043459  }
  0xe5   :  { %v122_v34 = vmul.f32 1.442695, %v3122_v31  ;;  %v3130_v39 = vsub.f32 %v80_v15, %v105_v38  ;;  %vm3181_vm1 = vmpackc.low %vm1230_vm15, %vm1229_vm14  ;;  %v2512_v15 = vld [vmem:[#allocation6 + $0x7] ss:$0 sm:$0xff]  ;;  %vm225_vm15 = vcmask 1041409  }
  0xe6   :  { %v102_v36 = vpop.xlane.xlu0 %101  ;;  %vm1976_vm11 = vcmp.eq.s32.totalorder %v3143_v59, %v2512_v15  ;;  %vm1977_vm12 = vcmp.eq.s32.totalorder %v180_v60, %v2512_v15 }
  0xe7   :  { %2793 = vpow2.f32 %v122_v34  ;;  %v3128_v37 = vsub.f32 %v79_v14, %v102_v36  ;;  %v128_v43 = vmul.f32 1.442695, %v3130_v39  ;;  %v2499_v14 = vld [vmem:[#allocation6 + $0x6] ss:$0 sm:$0xff]  ;;  %vm3196_vm14 = vmpackc.low %vm1977_vm12, %vm1976_vm11  ;;  %vm240_vm11 = vcmask 1046534  }
  0xe8   :  { %2795 = vpow2.f32 %v124_v35  ;;  %vm1727_vm8 = vcmp.eq.s32.totalorder %v3143_v59, %v2499_v14  ;;  %vm1728_vm9 = vcmp.eq.s32.totalorder %v180_v60, %v2499_v14  ;;  %vm243_vm12 = vcmask 1047559  }
  0xe9   :  { %v2786_v40 = vpop.eup %2785  ;;  %v126_v41 = vmul.f32 1.442695, %v3128_v37  ;;  %vm3192_vm6 = vmpackc.low %vm1728_vm9, %vm1727_vm8  ;;  %vm234_vm8 = vcmask 1044484   ;;  %vm237_vm9 = vcmask 1045509  }
  0xea   :  { %v2788_v42 = vpop.eup %2787  ;;  %v130_v44 = vsel %vm3730_vm0, %v2786_v40, 0.0 }
  0xeb   :  { %2797 = vpow2.f32 %v126_v41  ;;  %131 = vadd.xlane.f32.xlu0 %v130_v44  ;;  %v136_v45 = vsel %vm3730_vm0, %v2788_v42, 0.0 }
  0xec   :  { %2799 = vpow2.f32 %v128_v43 }
  0xed   :  { %v2790_v46 = vpop.eup %2789 }
  0xee   :  { %v2792_v47 = vpop.eup %2791  ;;  %v133_v48 = vsel %vm3730_vm0, %v2790_v46, 0.0 }
  0xef   :  { %137 = vadd.xlane.f32.xlu0 %v136_v45  ;;  %134 = vadd.xlane.f32.xlu1 %v133_v48  ;;  %v139_v49 = vsel %vm3730_vm0, %v2792_v47, 0.0 }
  0xf1   :  { %v2794_v50 = vpop.eup %2793 }
  0xf2   :  { %v2796_v51 = vpop.eup %2795  ;;  %v142_v52 = vsel %vm3730_vm0, %v2794_v50, 0.0 }
  0xf3   :  { %140 = vadd.xlane.f32.xlu1 %v139_v49  ;;  %143 = vadd.xlane.f32.xlu0 %v142_v52  ;;  %v145_v53 = vsel %vm3730_vm0, %v2796_v51, 0.0 }
  0xf5   :  { %v2798_v54 = vpop.eup %2797 }
  0xf6   :  { %v2800_v55 = vpop.eup %2799  ;;  %v148_v56 = vsel %vm3730_vm0, %v2798_v54, 0.0 }
  0xf7   :  { %146 = vadd.xlane.f32.xlu1 %v145_v53  ;;  %149 = vadd.xlane.f32.xlu0 %v148_v56  ;;  %v151_v57 = vsel %vm3730_vm0, %v2800_v55, 0.0 }
  0xfb   :  { %152 = vadd.xlane.f32.xlu1 %v151_v57 }
 0x178   :  { %v132_v18 = vpop.xlane.xlu0 %131 }
 0x179   :  { %2801 = vlog2.f32 %v132_v18 }
 0x17c   :  { %v135_v20 = vpop.xlane.xlu1 %134  ;;  %v138_v22 = vpop.xlane.xlu0 %137 }
 0x17d   :  { %2803 = vlog2.f32 %v135_v20 }
 0x17e   :  { %2805 = vlog2.f32 %v138_v22 }
 0x180   :  { %v141_v23 = vpop.xlane.xlu1 %140  ;;  %v144_v24 = vpop.xlane.xlu0 %143 }
 0x181   :  { %2807 = vlog2.f32 %v141_v23 }
 0x182   :  { %2809 = vlog2.f32 %v144_v24 }
 0x183   :  { %v2802_v26 = vpop.eup %2801 }
 0x184   :  { %v155_v28 = vmul.f32 0.6931472, %v2802_v26  ;;  %v147_v29 = vpop.xlane.xlu1 %146  ;;  %v150_v30 = vpop.xlane.xlu0 %149 }
 0x185   :  { %2811 = vlog2.f32 %v147_v29 }
 0x186   :  { %v170_v32 = vsub.f32 %v3110_v19, %v155_v28  ;;  %2813 = vlog2.f32 %v150_v30 }
 0x187   :  { %v2804_v34 = vpop.eup %2803 }
 0x188   :  { %v2806_v35 = vpop.eup %2805  ;;  %v192_v36 = vpack.c.bf16 %v170_v32, %v170_v32  ;;  %v157_v38 = vmul.f32 0.6931472, %v2804_v34  ;;  %v153_v40 = vpop.xlane.xlu1 %152 }
 0x189   :  { %v159_v41 = vmul.f32 0.6931472, %v2806_v35  ;;  %2815 = vlog2.f32 %v153_v40 }
 0x18a   :  { %v3201_v42 = vunpack.c.l.bf16 %v192_v36  ;;  %v171_v43 = vsub.f32 %v3116_v25, %v157_v38 }
 0x18b   :  { %v2808_v44 = vpop.eup %2807  ;;  %v172_v45 = vsub.f32 %v3112_v21, %v159_v41 }
 0x18c   :  { %v2810_v46 = vpop.eup %2809  ;;  %v3206_v47 = vsub.f32 %v170_v32, %v3201_v42  ;;  %v193_v19 = vpack.c.bf16 %v171_v43, %v171_v43  ;;  %v161_v48 = vmul.f32 0.6931472, %v2808_v44  ;;  %v574_v49 = vrot.slane %v3201_v42, 1 }
 0x18d   :  { %v194_v50 = vpack.c.bf16 %v172_v45, %v172_v45  ;;  %v163_v51 = vmul.f32 0.6931472, %v2810_v46  ;;  %v823_v52 = vrot.slane %v3201_v42, 2  ;;  %v1072_v53 = vrot.slane %v3201_v42, 3 }
 0x18e   :  { %v3211_v25 = vunpack.c.l.bf16 %v193_v19  ;;  %v173_v21 = vsub.f32 %v3118_v27, %v161_v48  ;;  %v488_v54 = vrot.slane %v3206_v47, 1  ;;  %v737_v55 = vrot.slane %v3206_v47, 2 }
 0x18f   :  { %v2812_v56 = vpop.eup %2811  ;;  %v3216_v57 = vunpack.c.l.bf16 %v194_v50  ;;  %v174_v60 = vsub.f32 %v3122_v31, %v163_v51  ;;  %v986_v61 = vrot.slane %v3206_v47, 3  ;;  %v1235_v63 = vrot.slane %v3206_v47, 4 }
 0x190   :  { %v2814_v6 = vpop.eup %2813  ;;  %v3222_v7 = vsub.f32 %v171_v43, %v3211_v25  ;;  %v195_v10 = vpack.c.bf16 %v173_v21, %v173_v21  ;;  %v165_v27 = vmul.f32 0.6931472, %v2812_v56  ;;  %v325_v11 = vrot.slane %v3211_v25, 7 }
 0x191   :  { %v3226_v14 = vsub.f32 %v172_v45, %v3216_v57  ;;  %v196_v15 = vpack.c.bf16 %v174_v60, %v174_v60  ;;  %v167_v18 = vmul.f32 0.6931472, %v2814_v6  ;;  %v327_v31 = vrot.slane %v3216_v57, 6 }
 0x192   :  { %v3229_v20 = vunpack.c.l.bf16 %v195_v10  ;;  %v175_v22 = vsub.f32 %v3124_v33, %v165_v27  ;;  %v224_v23 = vrot.slane %v3222_v7, 7  ;;  %v489_v24 = vsel %vm225_vm15, %v3222_v7, %v488_v54 }
 0x193   :  { %v2816_v26 = vpop.eup %2815  ;;  %v3235_v28 = vunpack.c.l.bf16 %v196_v15  ;;  %v176_v29 = vsub.f32 %v3128_v37, %v167_v18  ;;  %v227_v30 = vrot.slane %v3226_v14, 6  ;;  %v490_v32 = vrot.slane %v3226_v14, 7 }
 0x194   :  { %v3241_v34 = vsub.f32 %v173_v21, %v3229_v20  ;;  %v197_v35 = vpack.c.bf16 %v175_v22, %v175_v22  ;;  %v169_v33 = vmul.f32 0.6931472, %v2816_v26  ;;  %v226_v36 = vsel %vm225_vm15, %v224_v23, %v3206_v47 }
 0x195   :  { %v3246_v38 = vsub.f32 %v174_v60, %v3235_v28  ;;  %v198_v40 = vpack.c.bf16 %v176_v29, %v176_v29  ;;  %v229_v37 = vsel %vm228_vm2, %v227_v30, %v226_v36  ;;  %v491_v41 = vsel %vm228_vm2, %v490_v32, %v489_v24 }
 0x196   :  { %v3250_v43 = vunpack.c.l.bf16 %v197_v35  ;;  %v177_v44 = vsub.f32 %v3130_v39, %v169_v33  ;;  %v230_v45 = vrot.slane %v3241_v34, 5  ;;  %v492_v46 = vrot.slane %v3241_v34, 6 }
 0x197   :  { %v3255_v19 = vunpack.c.l.bf16 %v198_v40  ;;  %v233_v48 = vrot.slane %v3246_v38, 4  ;;  %v494_v50 = vrot.slane %v3246_v38, 5  ;;  %v326_v51 = vsel %vm225_vm15, %v325_v11, %v3201_v42 }
 0x198   :  { %v3262_v21 = vsub.f32 %v175_v22, %v3250_v43  ;;  %v199_v54 = vpack.c.bf16 %v177_v44, %v177_v44  ;;  %v232_v39 = vsel %vm231_vm4, %v230_v45, %v229_v37  ;;  %v493_v56 = vsel %vm231_vm4, %v492_v46, %v491_v41 }
 0x199   :  { %v3267_v60 = vsub.f32 %v176_v29, %v3255_v19  ;;  %v235_v6 = vsel %vm234_vm8, %v233_v48, %v232_v39  ;;  %v495_v10 = vsel %vm234_vm8, %v494_v50, %v493_v56  ;;  %v328_v27 = vsel %vm228_vm2, %v327_v31, %v326_v51 }
 0x19a   :  { %v3272_v15 = vunpack.c.l.bf16 %v199_v54  ;;  %v236_v11 = vrot.slane %v3262_v21, 3  ;;  %v496_v18 = vrot.slane %v3262_v21, 4  ;;  %v329_v22 = vrot.slane %v3229_v20, 5 }
 0x19b   :  { %v239_v23 = vrot.slane %v3267_v60, 2  ;;  %v498_v24 = vrot.slane %v3267_v60, 3  ;;  %v331_v26 = vrot.slane %v3235_v28, 4  ;;  %v333_v29 = vrot.slane %v3250_v43, 3 }
 0x19c   :  { %v3282_v30 = vsub.f32 %v177_v44, %v3272_v15  ;;  %v238_v31 = vsel %vm237_vm9, %v236_v11, %v235_v6  ;;  %v497_v32 = vsel %vm237_vm9, %v496_v18, %v495_v10  ;;  %v330_v35 = vsel %vm231_vm4, %v329_v22, %v328_v27 }
 0x19d   :  { %v241_v33 = vsel %vm240_vm11, %v239_v23, %v238_v31  ;;  %v499_v36 = vsel %vm240_vm11, %v498_v24, %v497_v32  ;;  %v332_v40 = vsel %vm234_vm8, %v331_v26, %v330_v35  ;;  %v335_v37 = vrot.slane %v3255_v19, 2 }
 0x19e   :  { %v242_v41 = vrot.slane %v3282_v30, 1  ;;  %v500_v45 = vrot.slane %v3282_v30, 2  ;;  %v334_v44 = vsel %vm237_vm9, %v333_v29, %v332_v40  ;;  %v337_v46 = vrot.slane %v3272_v15, 1 }
 0x19f   :  { %v336_v48 = vsel %vm240_vm11, %v335_v37, %v334_v44  ;;  %v575_v50 = vsel %vm225_vm15, %v3211_v25, %v574_v49  ;;  %v576_v51 = vrot.slane %v3216_v57, 7  ;;  %v578_v54 = vrot.slane %v3229_v20, 6 }
 0x1a0   :  { %v244_v39 = vsel %vm243_vm12, %v242_v41, %v241_v33  ;;  %v501_v56 = vsel %vm243_vm12, %v500_v45, %v499_v36  ;;  %v338_v6 = vsel %vm243_vm12, %v337_v46, %v336_v48  ;;  %v580_v10 = vrot.slane %v3235_v28, 5 }
 0x1a1   :  { %2583 = vmatmul.mubr.msk.f32.vlgmr.msra.gmra.mrb[0].mxu0 %vm3730_vm0, %v244_v39  ;;  %2597 = vmatmul.mubr.msk.f32.vlgmr.msra.gmra.mrb[0].mxu1 %vm3730_vm0, %v501_v56  ;;  %v577_v27 = vsel %vm228_vm2, %v576_v51, %v575_v50  ;;  %v582_v49 = vrot.slane %v3250_v43, 4  ;;  %v584_v11 = vrot.slane %v3255_v19, 3  ;;  %v586_v18 = vrot.slane %v3272_v15, 2 }
 0x1a2   :  { %2695 = vmatpush3.bf16.msk.msra.mxu0 %vm3149_vm3, %v2996_v4  ;;  %2701 = vmatpush3.bf16.msk.msra.mxu1 %vm3161_vm7, %v2996_v4  ;;  %v579_v22 = vsel %vm231_vm4, %v578_v54, %v577_v27  ;;  %v738_v23 = vrot.slane %v3222_v7, 1  ;;  %v741_v24 = vrot.slane %v3241_v34, 7  ;;  %v743_v26 = vrot.slane %v3246_v38, 6 }
 0x1a3   :  { %vm3747_vm0 = vmmov 0   ;;  %v581_v2 = vsel %vm234_vm8, %v580_v10, %v579_v22  ;;  %v745_v29 = vrot.slane %v3262_v21, 5  ;;  %v747_v5 = vrot.slane %v3267_v60, 4  ;;  %2702 = vmatprep.subr.bf16.mxu0 %v2993_v62  ;;  %2708 = vmatprep.subr.bf16.mxu1 %v2993_v62 }
 0x1a4   :  { %2589 = vmatprep.mubr.msk.f32.mxu0 %vm3747_vm0, %v2995_v3  ;;  %2603 = vmatprep.mubr.msk.f32.mxu1 %vm3747_vm0, %v2995_v3  ;;  %v749_v31 = vrot.slane %v3282_v30, 3  ;;  %v583_v32 = vsel %vm237_vm9, %v582_v49, %v581_v2  ;;  %v739_v35 = vsel %vm225_vm15, %v738_v23, %v737_v55  ;;  %v987_v33 = vrot.slane %v3222_v7, 2 }
 0x1a5   :  { %v989_v36 = vrot.slane %v3226_v14, 1  ;;  %v585_v40 = vsel %vm240_vm11, %v584_v11, %v583_v32  ;;  %v740_v37 = vsel %vm228_vm2, %v3226_v14, %v739_v35  ;;  %v992_v41 = vrot.slane %v3246_v38, 7 }
 0x1a6   :  { %v994_v45 = vrot.slane %v3262_v21, 6  ;;  %v587_v44 = vsel %vm243_vm12, %v586_v18, %v585_v40  ;;  %v742_v46 = vsel %vm231_vm4, %v741_v24, %v740_v37  ;;  %v988_v55 = vsel %vm225_vm15, %v987_v33, %v986_v61 }
 0x1a7   :  { %v996_v48 = vrot.slane %v3267_v60, 5  ;;  %v744_v50 = vsel %vm234_vm8, %v743_v26, %v742_v46  ;;  %v990_v51 = vsel %vm228_vm2, %v989_v36, %v988_v55  ;;  %v998_v54 = vrot.slane %v3282_v30, 4 }
 0x1a8   :  { %v824_v39 = vrot.slane %v3211_v25, 1  ;;  %v746_v56 = vsel %vm237_vm9, %v745_v29, %v744_v50  ;;  %v991_v10 = vsel %vm231_vm4, %v3241_v34, %v990_v51  ;;  %v827_v27 = vrot.slane %v3229_v20, 7 }
 0x1a9   :  { %v829_v49 = vrot.slane %v3235_v28, 6  ;;  %vm3748_vm3 = vcmask 130048   ;;  %v748_v61 = vsel %vm240_vm11, %v747_v5, %v746_v56  ;;  %v993_v11 = vsel %vm234_vm8, %v992_v41, %v991_v10 }
 0x1aa   :  { %2590 = vmatmul.mubr.msk.f32.vlgmr.msra.gmra.mrb[0].mxu0 %vm3748_vm3, %v338_v6  ;;  %vm3749_vm7 = vmmov %vm3748_vm3  ;;  %v825_v18 = vsel %vm225_vm15, %v824_v39, %v823_v52  ;;  %v831_v22 = vrot.slane %v3250_v43, 5  ;;  %v750_v6 = vsel %vm243_vm12, %v749_v31, %v748_v61  ;;  %v995_v23 = vsel %vm237_vm9, %v994_v45, %v993_v11 }
 0x1ab   :  { %2604 = vmatmul.mubr.msk.f32.vlgmr.msra.gmra.mrb[0].mxu1 %vm3749_vm7, %v587_v44  ;;  %2704 = vmatpush3.bf16.msk.msra.mxu0 %vm3171_vm10, %v2996_v4  ;;  %v826_v24 = vsel %vm228_vm2, %v3216_v57, %v825_v18  ;;  %v833_v26 = vrot.slane %v3255_v19, 4  ;;  %v997_v52 = vsel %vm240_vm11, %v996_v48, %v995_v23  ;;  %v835_v29 = vrot.slane %v3272_v15, 3  ;;  %vm3750_vm7 = vmmov %vm3748_vm3 }
 0x1ac   :  { %2710 = vmatpush3.bf16.msk.msra.mxu1 %vm3176_vm13, %v2996_v4  ;;  %2610 = vmatprep.mubr.msk.f32.mxu0 %vm3747_vm0, %v2995_v3  ;;  %v828_v2 = vsel %vm231_vm4, %v827_v27, %v826_v24  ;;  %v1073_v5 = vrot.slane %v3211_v25, 2  ;;  %v999_v31 = vsel %vm243_vm12, %v998_v54, %v997_v52  ;;  %v1075_v35 = vrot.slane %v3216_v57, 1 }
 0x1ad   :  { %2705 = vmatprep.subr.bf16.mxu0 %v2993_v62  ;;  %2624 = vmatprep.mubr.msk.f32.mxu1 %vm3747_vm0, %v2995_v3  ;;  %v830_v32 = vsel %vm234_vm8, %v829_v49, %v828_v2  ;;  %v1078_v33 = vrot.slane %v3235_v28, 7  ;;  %v1080_v37 = vrot.slane %v3250_v43, 6  ;;  %v1082_v41 = vrot.slane %v3255_v19, 5 }
 0x1ae   :  { %2711 = vmatprep.subr.bf16.mxu1 %v2993_v62  ;;  %2611 = vmatmul.mubr.msk.f32.vlgmr.msra.gmra.mrb[2].mxu0 %vm3748_vm3, %v750_v6  ;;  %v832_v36 = vsel %vm237_vm9, %v831_v22, %v830_v32  ;;  %v1074_v40 = vsel %vm225_vm15, %v1073_v5, %v1072_v53  ;;  %v1084_v46 = vrot.slane %v3272_v15, 4  ;;  %v1236_v53 = vrot.slane %v3222_v7, 3 }
 0x1af   :  { %2625 = vmatmul.mubr.msk.f32.vlgmr.msra.gmra.mrb[2].mxu1 %vm3750_vm7, %v999_v31  ;;  %2707 = vmatpush3.bf16.msk.msra.mxu0 %vm3171_vm10, %v2996_v4  ;;  %v834_v45 = vsel %vm240_vm11, %v833_v26, %v832_v36  ;;  %v1076_v44 = vsel %vm228_vm2, %v1075_v35, %v1074_v40  ;;  %v1238_v55 = vrot.slane %v3226_v14, 2  ;;  %v1240_v48 = vrot.slane %v3241_v34, 1  ;;  %vm3751_vm10 = vmmov %vm3748_vm3 }
 0x1b0   :  { %2713 = vmatpush3.bf16.msk.msra.mxu1 %vm3176_vm13, %v2996_v4  ;;  %2617 = vmatprep.mubr.msk.f32.mxu0 %vm3747_vm0, %v2995_v3  ;;  %v836_v8 = vsel %vm243_vm12, %v835_v29, %v834_v45  ;;  %v1077_v9 = vsel %vm231_vm4, %v3229_v20, %v1076_v44  ;;  %v1237_v51 = vsel %vm225_vm15, %v1236_v53, %v1235_v63  ;;  %v1243_v54 = vrot.slane %v3262_v21, 7  ;;  %vm3752_vm13 = vmmov %vm3748_vm3 }
 0x1b1   :  { %2631 = vmatprep.mubr.msk.f32.mxu1 %vm3747_vm0, %v2995_v3  ;;  %2714 = vmatprep.subr.bf16.mxu0 %v2993_v62  ;;  %v1079_v50 = vsel %vm234_vm8, %v1078_v33, %v1077_v9  ;;  %v1245_v39 = vrot.slane %v3267_v60, 6  ;;  %v1239_v10 = vsel %vm228_vm2, %v1238_v55, %v1237_v51  ;;  %v1247_v27 = vrot.slane %v3282_v30, 5  ;;  %vm3753_vm7 = vmmov %vm3748_vm3 }
 0x1b2   :  { %2720 = vmatprep.subr.bf16.mxu1 %v2993_v62  ;;  %v1081_v56 = vsel %vm237_vm9, %v1080_v37, %v1079_v50  ;;  %v1484_v49 = vrot.slane %v3206_v47, 5  ;;  %v1241_v11 = vsel %vm231_vm4, %v1240_v48, %v1239_v10  ;;  %v1485_v18 = vrot.slane %v3222_v7, 4 }
 0x1b3   :  { %v1083_v61 = vsel %vm240_vm11, %v1082_v41, %v1081_v56  ;;  %v1487_v63 = vrot.slane %v3226_v14, 3  ;;  %v1242_v6 = vsel %vm234_vm8, %v3246_v38, %v1241_v11  ;;  %v1489_v23 = vrot.slane %v3241_v34, 2 }
 0x1b4   :  { %v1085_v22 = vsel %vm243_vm12, %v1084_v46, %v1083_v61  ;;  %v1491_v24 = vrot.slane %v3246_v38, 1  ;;  %v1244_v26 = vsel %vm237_vm9, %v1243_v54, %v1242_v6  ;;  %v1486_v52 = vsel %vm225_vm15, %v1485_v18, %v1484_v49 }
 0x1b5   :  { %v1494_v2 = vrot.slane %v3267_v60, 7  ;;  %v1496_v29 = vrot.slane %v3282_v30, 6  ;;  %v1246_v5 = vsel %vm240_vm11, %v1245_v39, %v1244_v26  ;;  %v1488_v31 = vsel %vm228_vm2, %v1487_v63, %v1486_v52 }
 0x1b6   :  { %2618 = vmatmul.mubr.msk.f32.vlgmr.msra.gmra.mrb[2].mxu0 %vm3751_vm10, %v836_v8  ;;  %v1321_v32 = vrot.slane %v3201_v42, 4  ;;  %v1322_v35 = vrot.slane %v3211_v25, 3  ;;  %v1248_v33 = vsel %vm243_vm12, %v1247_v27, %v1246_v5  ;;  %v1490_v36 = vsel %vm231_vm4, %v1489_v23, %v1488_v31 }
 0x1b7   :  { %2632 = vmatmul.mubr.msk.f32.vlgmr.msra.gmra.mrb[2].mxu1 %vm3752_vm13, %v1085_v22  ;;  %2716 = vmatpush3.bf16.msk.msra.mxu0 %vm3181_vm1, %v2996_v4  ;;  %v1324_v40 = vrot.slane %v3216_v57, 2  ;;  %v1326_v37 = vrot.slane %v3229_v20, 1  ;;  %v1492_v41 = vsel %vm234_vm8, %v1491_v24, %v1490_v36  ;;  %v1329_v44 = vrot.slane %v3250_v43, 7 }
 0x1b8   :  { %2722 = vmatpush3.bf16.msk.msra.mxu1 %vm3186_vm5, %v2996_v4  ;;  %2638 = vmatprep.mubr.msk.f32.mxu0 %vm3747_vm0, %v2995_v3  ;;  %v1323_v45 = vsel %vm225_vm15, %v1322_v35, %v1321_v32  ;;  %v1331_v46 = vrot.slane %v3255_v19, 6  ;;  %v1493_v53 = vsel %vm237_vm9, %v3262_v21, %v1492_v41  ;;  %v1333_v9 = vrot.slane %v3272_v15, 5 }
 0x1b9   :  { %2717 = vmatprep.subr.bf16.mxu0 %v2993_v62  ;;  %2652 = vmatprep.mubr.msk.f32.mxu1 %vm3747_vm0, %v2995_v3  ;;  %v1325_v8 = vsel %vm228_vm2, %v1324_v40, %v1323_v45  ;;  %v1570_v55 = vrot.slane %v3201_v42, 5  ;;  %v1495_v48 = vsel %vm240_vm11, %v1494_v2, %v1493_v53  ;;  %v1571_v51 = vrot.slane %v3211_v25, 4 }
 0x1ba   :  { %2723 = vmatprep.subr.bf16.mxu1 %v2993_v62  ;;  %2639 = vmatmul.mubr.msk.f32.vlgmr.msra.gmra.mrb[4].mxu0 %vm3748_vm3, %v1248_v33  ;;  %v1327_v50 = vsel %vm231_vm4, %v1326_v37, %v1325_v8  ;;  %v1573_v54 = vrot.slane %v3216_v57, 3  ;;  %v1497_v39 = vsel %vm243_vm12, %v1496_v29, %v1495_v48  ;;  %v1575_v10 = vrot.slane %v3229_v20, 2 }
 0x1bb   :  { %2719 = vmatpush3.bf16.msk.msra.mxu0 %vm3181_vm1, %v2996_v4  ;;  %2645 = vmatprep.mubr.msk.f32.mxu0 %vm3747_vm0, %v2995_v3  ;;  %v1328_v56 = vsel %vm234_vm8, %v3235_v28, %v1327_v50  ;;  %v1577_v27 = vrot.slane %v3235_v28, 1  ;;  %v1572_v12 = vsel %vm225_vm15, %v1571_v51, %v1570_v55  ;;  %v1580_v61 = vrot.slane %v3255_v19, 7  ;;  %vm3754_vm1 = vmmov %vm3748_vm3 }
 0x1bc   :  { %2653 = vmatmul.mubr.msk.f32.vlgmr.msra.gmra.mrb[4].mxu1 %vm3753_vm7, %v1497_v39  ;;  %2726 = vmatprep.subr.bf16.mxu0 %v2993_v62  ;;  %v1330_v49 = vsel %vm237_vm9, %v1329_v44, %v1328_v56  ;;  %v1582_v11 = vrot.slane %v3272_v15, 6  ;;  %v1574_v63 = vsel %vm228_vm2, %v1573_v54, %v1572_v12  ;;  %v1733_v22 = vrot.slane %v3206_v47, 6  ;;  %vm3756_vm10 = vmmov %vm3754_vm1 }
 0x1bd   :  { %2725 = vmatpush3.bf16.msk.msra.mxu1 %vm3186_vm5, %v2996_v4  ;;  %2659 = vmatprep.mubr.msk.f32.mxu1 %vm3747_vm0, %v2995_v3  ;;  %v1332_v18 = vsel %vm240_vm11, %v1331_v46, %v1330_v49  ;;  %v1734_v6 = vrot.slane %v3222_v7, 5  ;;  %v1576_v24 = vsel %vm231_vm4, %v1575_v10, %v1574_v63  ;;  %v1736_v13 = vrot.slane %v3226_v14, 4  ;;  %vm3755_vm5 = vmmov %vm3754_vm1 }
 0x1be   :  { %2732 = vmatprep.subr.bf16.mxu1 %v2993_v62  ;;  %v1334_v23 = vsel %vm243_vm12, %v1333_v9, %v1332_v18  ;;  %v1738_v26 = vrot.slane %v3241_v34, 3  ;;  %v1578_v52 = vsel %vm234_vm8, %v1577_v27, %v1576_v24  ;;  %v1740_v29 = vrot.slane %v3246_v38, 2 }
 0x1bf   :  { %v1735_v2 = vsel %vm225_vm15, %v1734_v6, %v1733_v22  ;;  %v1742_v5 = vrot.slane %v3262_v21, 1  ;;  %v1579_v31 = vsel %vm237_vm9, %v3250_v43, %v1578_v52  ;;  %v1745_v35 = vrot.slane %v3282_v30, 7 }
 0x1c0   :  { %v1737_v32 = vsel %vm228_vm2, %v1736_v13, %v1735_v2  ;;  %v1982_v33 = vrot.slane %v3206_v47, 7  ;;  %v1581_v36 = vsel %vm240_vm11, %v1580_v61, %v1579_v31  ;;  %v1983_v37 = vrot.slane %v3222_v7, 6 }
 0x1c1   :  { %v1739_v40 = vsel %vm231_vm4, %v1738_v26, %v1737_v32  ;;  %v1985_v41 = vrot.slane %v3226_v14, 5  ;;  %v1583_v45 = vsel %vm243_vm12, %v1582_v11, %v1581_v36  ;;  %v1987_v46 = vrot.slane %v3241_v34, 4 }
 0x1c2   :  { %2646 = vmatmul.mubr.msk.f32.vlgmr.msra.gmra.mrb[4].mxu0 %vm3754_vm1, %v1334_v23  ;;  %v1741_v44 = vsel %vm234_vm8, %v1740_v29, %v1739_v40  ;;  %v1989_v53 = vrot.slane %v3246_v38, 3  ;;  %v1984_v7 = vsel %vm225_vm15, %v1983_v37, %v1982_v33  ;;  %v1991_v14 = vrot.slane %v3262_v21, 2 }
 0x1c3   :  { %2728 = vmatpush3.bf16.msk.msra.mxu0 %vm3192_vm6, %v2996_v4  ;;  %2666 = vmatprep.mubr.msk.f32.mxu0 %vm3747_vm0, %v2995_v3  ;;  %v1743_v47 = vsel %vm237_vm9, %v1742_v5, %v1741_v44  ;;  %v1993_v8 = vrot.slane %v3267_v60, 1  ;;  %v1986_v38 = vsel %vm228_vm2, %v1985_v41, %v1984_v7  ;;  %v1819_v9 = vrot.slane %v3201_v42, 6 }
 0x1c4   :  { %2660 = vmatmul.mubr.msk.f32.vlgmr.msra.gmra.mrb[4].mxu1 %vm3755_vm5, %v1583_v45  ;;  %2729 = vmatprep.subr.bf16.mxu0 %v2993_v62  ;;  %v1744_v34 = vsel %vm240_vm11, %v3267_v60, %v1743_v47  ;;  %v1820_v55 = vrot.slane %v3211_v25, 5  ;;  %v1988_v48 = vsel %vm231_vm4, %v1987_v46, %v1986_v38  ;;  %v1822_v50 = vrot.slane %v3216_v57, 4 }
 0x1c5   :  { %2734 = vmatpush3.bf16.msk.msra.mxu1 %vm3196_vm14, %v2996_v4  ;;  %2680 = vmatprep.mubr.msk.f32.mxu1 %vm3747_vm0, %v2995_v3  ;;  %v1746_v21 = vsel %vm243_vm12, %v1745_v35, %v1744_v34  ;;  %v1824_v60 = vrot.slane %v3229_v20, 3  ;;  %v1990_v51 = vsel %vm234_vm8, %v1989_v53, %v1988_v48  ;;  %v1826_v39 = vrot.slane %v3235_v28, 2 }
 0x1c6   :  { %2735 = vmatprep.subr.bf16.mxu1 %v2993_v62  ;;  %2667 = vmatmul.mubr.msk.f32.vlgmr.msra.gmra.mrb[6].mxu0 %vm3756_vm10, %v1746_v21  ;;  %v1821_v54 = vsel %vm225_vm15, %v1820_v55, %v1819_v9  ;;  %v1828_v56 = vrot.slane %v3250_v43, 1  ;;  %v1992_v10 = vsel %vm237_vm9, %v1991_v14, %v1990_v51  ;;  %v1831_v27 = vrot.slane %v3272_v15, 7 }
 0x1c7   :  { %2731 = vmatpush3.bf16.msk.msra.mxu0 %vm3192_vm6, %v2996_v4  ;;  %2673 = vmatprep.mubr.msk.f32.mxu0 %vm3747_vm0, %v2995_v3  ;;  %v1823_v62 = vsel %vm228_vm2, %v1822_v50, %v1821_v54  ;;  %v2068_v49 = vrot.slane %v3201_v42, 7  ;;  %v1994_v12 = vsel %vm240_vm11, %v1993_v8, %v1992_v10  ;;  %v2069_v11 = vrot.slane %v3211_v25, 6  ;;  %vm3757_vm6 = vmmov %vm3754_vm1 }
 0x1c8   :  { %v1825_v61 = vsel %vm231_vm4, %v1824_v60, %v1823_v62  ;;  %v2071_v16 = vrot.slane %v3216_v57, 5  ;;  %v1995_v18 = vsel %vm243_vm12, %v3282_v30, %v1994_v12  ;;  %v2073_v22 = vrot.slane %v3229_v20, 4 }
 0x1c9   :  { %v1827_v63 = vsel %vm234_vm8, %v1826_v39, %v1825_v61  ;;  %v2075_v6 = vrot.slane %v3235_v28, 3  ;;  %2681 = vmatmul.mubr.msk.f32.vlgmr.msra.gmra.mrb[6].mxu1 %vm3757_vm6, %v1995_v18  ;;  %v2070_v23 = vsel %vm225_vm15, %v2069_v11, %v2068_v49  ;;  %v2077_v24 = vrot.slane %v3250_v43, 2  ;;  %vm3758_vm15 = vmmov %vm3754_vm1 }
 0x1ca   :  { %v1829_v42 = vsel %vm237_vm9, %v1828_v56, %v1827_v63  ;;  %2737 = vmatpush3.bf16.msk.msra.mxu1 %vm3196_vm14, %v2996_v4  ;;  %2687 = vmatprep.mubr.msk.f32.mxu1 %vm3747_vm0, %v2995_v3  ;;  %v2072_v25 = vsel %vm228_vm2, %v2071_v16, %v2070_v23  ;;  %v2079_v57 = vrot.slane %v3255_v19, 1  ;;  %vm3759_vm0 = vmmov %vm3754_vm1  ;;  %v3599_v13 = vand.u32 127, %v178_v58 }
 0x1cb   :  { %v1830_v20 = vsel %vm240_vm11, %v3255_v19, %v1829_v42  ;;  %v2074_v28 = vsel %vm231_vm4, %v2073_v22, %v2072_v25  ;;  %v2997_v19 = vmov -1e+30   ;;  %v2998_v52 = vmov 1966171168  }
 0x1cc   :  { %v1832_v30 = vsel %vm243_vm12, %v1831_v27, %v1830_v20  ;;  %v2076_v43 = vsel %vm234_vm8, %v2075_v6, %v2074_v28  ;;  %vm2222_vm14 = vcmp.ge.s32.totalorder %v3599_v13, 1  ;;  %v414_v2 = vunpack.c.l.s4 %v2998_v52 }
 0x1cd   :  { %v2078_v4 = vsel %vm237_vm9, %v2077_v24, %v2076_v43  ;;  %v3602_v26 = vsel %vm2222_vm14, 0.0, %v2997_v19  ;;  %vm2229_vm4 = vcmp.le.s32.totalorder %v3599_v13, 1 }
 0x1ce   :  { %2674 = vmatmul.mubr.msk.f32.vlgmr.msra.gmra.mrb[6].mxu0 %vm3758_vm15, %v1832_v30  ;;  %v2080_v17 = vsel %vm240_vm11, %v2079_v57, %v2078_v4  ;;  %v415_v29 = vunpack.c.0.s8 %v414_v2 }
 0x1cf   :  { %v2081_v3 = vsel %vm243_vm12, %v3272_v15, %v2080_v17 }
 0x1d0   :  { %v3605_v5 = vsub.s32 %v415_v29, %v3143_v59 }
 0x1d1   :  { %2688 = vmatmul.mubr.msk.f32.vlgmr.msra.gmra.mrb[6].mxu1 %vm3759_vm0, %v2081_v3 }
 0x27d   :  { %v407_v31 = vpop.f32.mrb[0].mxu0 }
 0x27e   :  { %v656_v32 = vpop.f32.mrb[0].mxu1  ;;  %v412_v35 = vcombine.high %v407_v31, %v407_v31  ;;  %v419_v15 = vrot.slane %v407_v31, %v3605_v5  ;;  %v2591_v36 = vpop.f32.mrb[1].mxu0 }
 0x27f   :  { %v661_v33 = vcombine.high %v656_v32, %v656_v32  ;;  %v668_v58 = vrot.slane %v656_v32, %v3605_v5  ;;  %v2605_v40 = vpop.f32.mrb[1].mxu1 }
 0x280   :  { %v426_v37 = vrot.slane %v412_v35, %v3605_v5  ;;  %v427_v41 = vcombine.high %v419_v15, %v419_v15  ;;  %v435_v45 = vrot.slane %v419_v15, %v3605_v5  ;;  %2430 = vst.sshfl [vmem:[#allocation2] sm:$0x1 pattern:$0x73625140] %v419_v15 }
 0x281   :  { %v675_v44 = vrot.slane %v661_v33, %v3605_v5  ;;  %2443 = vst.sshfl [vmem:[#allocation2 + $0x1] sm:$0x1 pattern:$0x73625140] %v668_v58  ;;  %v676_v59 = vcombine.high %v668_v58, %v668_v58  ;;  %v684_v46 = vrot.slane %v668_v58, %v3605_v5 }
 0x282   :  { %v428_v53 = vcombine.high %v426_v37, %v426_v37  ;;  %v442_v47 = vrot.slane %v426_v37, %v3605_v5  ;;  %v449_v7 = vrot.slane %v427_v41, %v3605_v5  ;;  %v457_v14 = vcombine.high %v435_v45, %v435_v45  ;;  %2431 = vst.sshfl [vmem:[#allocation2 + $0x8] sm:$0x1 pattern:$0x73625140] %v427_v41 }
 0x283   :  { %2432 = vst.sshfl [vmem:[#allocation2 + $0x20] sm:$0x1 pattern:$0x73625140] %v426_v37  ;;  %v677_v8 = vcombine.high %v675_v44, %v675_v44  ;;  %v691_v34 = vrot.slane %v675_v44, %v3605_v5  ;;  %v698_v38 = vrot.slane %v676_v59, %v3605_v5  ;;  %v706_v9 = vcombine.high %v684_v46, %v684_v46 }
 0x284   :  { %2445 = vst.sshfl [vmem:[#allocation2 + $0x21] sm:$0x1 pattern:$0x73625140] %v675_v44  ;;  %v456_v55 = vrot.slane %v428_v53, %v3605_v5  ;;  %v458_v21 = vcombine.high %v442_v47, %v442_v47  ;;  %v459_v48 = vcombine.high %v449_v7, %v449_v7  ;;  %471 = vst [vmem:[#allocation2 + $0x10] sm:$0x1] %v457_v14 }
 0x285   :  { %2444 = vst.sshfl [vmem:[#allocation2 + $0x9] sm:$0x1 pattern:$0x73625140] %v676_v59  ;;  %v705_v50 = vrot.slane %v677_v8, %v3605_v5  ;;  %v707_v60 = vcombine.high %v691_v34, %v691_v34  ;;  %v708_v51 = vcombine.high %v698_v38, %v698_v38  ;;  %720 = vst [vmem:[#allocation2 + $0x11] sm:$0x1] %v706_v9 }
 0x286   :  { %2433 = vst.sshfl [vmem:[#allocation2 + $0x28] sm:$0x1 pattern:$0x73625140] %v428_v53  ;;  %v460_v54 = vcombine.high %v456_v55, %v456_v55  ;;  %472 = vst [vmem:[#allocation2 + $0x18] sm:$0x1] %v459_v48 }
 0x287   :  { %2446 = vst.sshfl [vmem:[#allocation2 + $0x29] sm:$0x1 pattern:$0x73625140] %v677_v8  ;;  %475 = vst [vmem:[#allocation2 + $0x30] sm:$0x1] %v458_v21  ;;  %v709_v39 = vcombine.high %v705_v50, %v705_v50 }
 0x288   :  { %721 = vst [vmem:[#allocation2 + $0x19] sm:$0x1] %v708_v51  ;;  %724 = vst [vmem:[#allocation2 + $0x31] sm:$0x1] %v707_v60 }
 0x289   :  { %476 = vst [vmem:[#allocation2 + $0x38] sm:$0x1] %v460_v54  ;;  %725 = vst [vmem:[#allocation2 + $0x39] sm:$0x1] %v709_v39  ;;  %v905_v56 = vpop.f32.mrb[2].mxu0 }
 0x28a   :  { %v1154_v10 = vpop.f32.mrb[2].mxu1  ;;  %v910_v62 = vcombine.high %v905_v56, %v905_v56  ;;  %v917_v27 = vrot.slane %v905_v56, %v3605_v5  ;;  %v2619_v61 = vpop.f32.mrb[3].mxu0 }
 0x28b   :  { %v1159_v49 = vcombine.high %v1154_v10, %v1154_v10  ;;  %v1166_v12 = vrot.slane %v1154_v10, %v3605_v5  ;;  %v2633_v11 = vpop.f32.mrb[3].mxu1 }
 0x28c   :  { %v924_v16 = vrot.slane %v910_v62, %v3605_v5  ;;  %v925_v18 = vcombine.high %v917_v27, %v917_v27  ;;  %v933_v63 = vrot.slane %v917_v27, %v3605_v5  ;;  %2456 = vst.sshfl [vmem:[#allocation2 + $0x2] sm:$0x1 pattern:$0x73625140] %v917_v27 }
 0x28d   :  { %v1173_v22 = vrot.slane %v1159_v49, %v3605_v5  ;;  %2469 = vst.sshfl [vmem:[#allocation2 + $0x3] sm:$0x1 pattern:$0x73625140] %v1166_v12  ;;  %v1174_v6 = vcombine.high %v1166_v12, %v1166_v12  ;;  %v1182_v42 = vrot.slane %v1166_v12, %v3605_v5 }
 0x28e   :  { %v926_v23 = vcombine.high %v924_v16, %v924_v16  ;;  %v940_v24 = vrot.slane %v924_v16, %v3605_v5  ;;  %v947_v25 = vrot.slane %v925_v18, %v3605_v5  ;;  %v955_v57 = vcombine.high %v933_v63, %v933_v63  ;;  %2457 = vst.sshfl [vmem:[#allocation2 + $0xa] sm:$0x1 pattern:$0x73625140] %v925_v18 }
 0x28f   :  { %2458 = vst.sshfl [vmem:[#allocation2 + $0x22] sm:$0x1 pattern:$0x73625140] %v924_v16  ;;  %v1175_v20 = vcombine.high %v1173_v22, %v1173_v22  ;;  %v1189_v28 = vrot.slane %v1173_v22, %v3605_v5  ;;  %v1196_v30 = vrot.slane %v1174_v6, %v3605_v5  ;;  %v1204_v43 = vcombine.high %v1182_v42, %v1182_v42 }
 0x290   :  { %2471 = vst.sshfl [vmem:[#allocation2 + $0x23] sm:$0x1 pattern:$0x73625140] %v1173_v22  ;;  %v954_v4 = vrot.slane %v926_v23, %v3605_v5  ;;  %v956_v17 = vcombine.high %v940_v24, %v940_v24  ;;  %v957_v3 = vcombine.high %v947_v25, %v947_v25  ;;  %969 = vst [vmem:[#allocation2 + $0x12] sm:$0x1] %v955_v57 }
 0x291   :  { %2470 = vst.sshfl [vmem:[#allocation2 + $0xb] sm:$0x1 pattern:$0x73625140] %v1174_v6  ;;  %v1203_v19 = vrot.slane %v1175_v20, %v3605_v5  ;;  %v1205_v52 = vcombine.high %v1189_v28, %v1189_v28  ;;  %v1206_v2 = vcombine.high %v1196_v30, %v1196_v30  ;;  %1218 = vst [vmem:[#allocation2 + $0x13] sm:$0x1] %v1204_v43 }
 0x292   :  { %2459 = vst.sshfl [vmem:[#allocation2 + $0x2a] sm:$0x1 pattern:$0x73625140] %v926_v23  ;;  %v958_v29 = vcombine.high %v954_v4, %v954_v4  ;;  %970 = vst [vmem:[#allocation2 + $0x1a] sm:$0x1] %v957_v3 }
 0x293   :  { %2472 = vst.sshfl [vmem:[#allocation2 + $0x2b] sm:$0x1 pattern:$0x73625140] %v1175_v20  ;;  %973 = vst [vmem:[#allocation2 + $0x32] sm:$0x1] %v956_v17  ;;  %v1207_v31 = vcombine.high %v1203_v19, %v1203_v19 }
 0x294   :  { %1219 = vst [vmem:[#allocation2 + $0x1b] sm:$0x1] %v1206_v2  ;;  %1222 = vst [vmem:[#allocation2 + $0x33] sm:$0x1] %v1205_v52  ;;  %v3649_v25 = vld [vmem:[#allocation8] sm:$0xff] }
 0x295   :  { %974 = vst [vmem:[#allocation2 + $0x3a] sm:$0x1] %v958_v29  ;;  %1223 = vst [vmem:[#allocation2 + $0x3b] sm:$0x1] %v1207_v31  ;;  %v1403_v32 = vpop.f32.mrb[4].mxu0  ;;  %vm2225_vm2 = vcmp.gt.f32.partialorder %v3649_v25, 0.5 }
 0x296   :  { %v1408_v35 = vcombine.high %v1403_v32, %v1403_v32  ;;  %v1415_v15 = vrot.slane %v1403_v32, %v3605_v5  ;;  %v2647_v33 = vpop.f32.mrb[5].mxu0  ;;  %vm2232_vm8 = vmand %vm2225_vm2, %vm2229_vm4 }
 0x297   :  { %v1652_v58 = vpop.f32.mrb[4].mxu1 }
 0x298   :  { %v1422_v36 = vrot.slane %v1408_v35, %v3605_v5  ;;  %v1423_v40 = vcombine.high %v1415_v15, %v1415_v15  ;;  %v1431_v37 = vrot.slane %v1415_v15, %v3605_v5  ;;  %2482 = vst.sshfl [vmem:[#allocation2 + $0x4] sm:$0x1 pattern:$0x73625140] %v1415_v15  ;;  %v1657_v41 = vcombine.high %v1652_v58, %v1652_v58  ;;  %v2661_v45 = vpop.f32.mrb[5].mxu1 }
 0x299   :  { %v1664_v44 = vrot.slane %v1652_v58, %v3605_v5 }
 0x29a   :  { %v1424_v59 = vcombine.high %v1422_v36, %v1422_v36  ;;  %v1438_v46 = vrot.slane %v1422_v36, %v3605_v5  ;;  %v1445_v53 = vrot.slane %v1423_v40, %v3605_v5  ;;  %v1453_v47 = vcombine.high %v1431_v37, %v1431_v37  ;;  %2483 = vst.sshfl [vmem:[#allocation2 + $0xc] sm:$0x1 pattern:$0x73625140] %v1423_v40 }
 0x29b   :  { %2484 = vst.sshfl [vmem:[#allocation2 + $0x24] sm:$0x1 pattern:$0x73625140] %v1422_v36  ;;  %v1671_v7 = vrot.slane %v1657_v41, %v3605_v5  ;;  %v1672_v14 = vcombine.high %v1664_v44, %v1664_v44  ;;  %v1680_v8 = vrot.slane %v1664_v44, %v3605_v5 }
 0x29c   :  { %2495 = vst.sshfl [vmem:[#allocation2 + $0x5] sm:$0x1 pattern:$0x73625140] %v1664_v44  ;;  %v1452_v34 = vrot.slane %v1424_v59, %v3605_v5  ;;  %v1454_v38 = vcombine.high %v1438_v46, %v1438_v46  ;;  %v1455_v9 = vcombine.high %v1445_v53, %v1445_v53  ;;  %1467 = vst [vmem:[#allocation2 + $0x14] sm:$0x1] %v1453_v47 }
 0x29d   :  { %2485 = vst.sshfl [vmem:[#allocation2 + $0x2c] sm:$0x1 pattern:$0x73625140] %v1424_v59  ;;  %v1673_v55 = vcombine.high %v1671_v7, %v1671_v7  ;;  %v1687_v21 = vrot.slane %v1671_v7, %v3605_v5  ;;  %v1694_v48 = vrot.slane %v1672_v14, %v3605_v5  ;;  %v1702_v50 = vcombine.high %v1680_v8, %v1680_v8 }
 0x29e   :  { %2496 = vst.sshfl [vmem:[#allocation2 + $0xd] sm:$0x1 pattern:$0x73625140] %v1672_v14  ;;  %v1456_v60 = vcombine.high %v1452_v34, %v1452_v34  ;;  %1468 = vst [vmem:[#allocation2 + $0x1c] sm:$0x1] %v1455_v9 }
 0x29f   :  { %2497 = vst.sshfl [vmem:[#allocation2 + $0x25] sm:$0x1 pattern:$0x73625140] %v1671_v7  ;;  %1471 = vst [vmem:[#allocation2 + $0x34] sm:$0x1] %v1454_v38  ;;  %v1701_v51 = vrot.slane %v1673_v55, %v3605_v5  ;;  %v1703_v54 = vcombine.high %v1687_v21, %v1687_v21  ;;  %v1704_v39 = vcombine.high %v1694_v48, %v1694_v48 }
 0x2a0   :  { %1716 = vst [vmem:[#allocation2 + $0x15] sm:$0x1] %v1702_v50  ;;  %2498 = vst.sshfl [vmem:[#allocation2 + $0x2d] sm:$0x1 pattern:$0x73625140] %v1673_v55 }
 0x2a1   :  { %1472 = vst [vmem:[#allocation2 + $0x3c] sm:$0x1] %v1456_v60  ;;  %v1705_v56 = vcombine.high %v1701_v51, %v1701_v51  ;;  %1717 = vst [vmem:[#allocation2 + $0x1d] sm:$0x1] %v1704_v39  ;;  %v1901_v10 = vpop.f32.mrb[6].mxu0 }
 0x2a2   :  { %1720 = vst [vmem:[#allocation2 + $0x35] sm:$0x1] %v1703_v54  ;;  %v1906_v62 = vcombine.high %v1901_v10, %v1901_v10  ;;  %v1913_v27 = vrot.slane %v1901_v10, %v3605_v5  ;;  %v2675_v49 = vpop.f32.mrb[7].mxu0 }
 0x2a3   :  { %1721 = vst [vmem:[#allocation2 + $0x3d] sm:$0x1] %v1705_v56 }
 0x2a4   :  { %v1920_v12 = vrot.slane %v1906_v62, %v3605_v5  ;;  %v1921_v61 = vcombine.high %v1913_v27, %v1913_v27  ;;  %v1929_v11 = vrot.slane %v1913_v27, %v3605_v5  ;;  %2508 = vst.sshfl [vmem:[#allocation2 + $0x6] sm:$0x1 pattern:$0x73625140] %v1913_v27  ;;  %v2150_v16 = vpop.f32.mrb[6].mxu1 }
 0x2a5   :  { %v2689_v42 = vpop.f32.mrb[7].mxu1  ;;  %v2155_v23 = vcombine.high %v2150_v16, %v2150_v16  ;;  %v2162_v24 = vrot.slane %v2150_v16, %v3605_v5 }
 0x2a6   :  { %v1922_v18 = vcombine.high %v1920_v12, %v1920_v12  ;;  %v1936_v63 = vrot.slane %v1920_v12, %v3605_v5  ;;  %v1943_v22 = vrot.slane %v1921_v61, %v3605_v5  ;;  %v1951_v6 = vcombine.high %v1929_v11, %v1929_v11  ;;  %2509 = vst.sshfl [vmem:[#allocation2 + $0xe] sm:$0x1 pattern:$0x73625140] %v1921_v61 }
 0x2a7   :  { %2510 = vst.sshfl [vmem:[#allocation2 + $0x26] sm:$0x1 pattern:$0x73625140] %v1920_v12  ;;  %v2169_v30 = vrot.slane %v2155_v23, %v3605_v5  ;;  %v2170_v43 = vcombine.high %v2162_v24, %v2162_v24  ;;  %v2178_v4 = vrot.slane %v2162_v24, %v3605_v5 }
 0x2a8   :  { %v1950_v57 = vrot.slane %v1922_v18, %v3605_v5  ;;  %v1952_v20 = vcombine.high %v1936_v63, %v1936_v63  ;;  %v1953_v28 = vcombine.high %v1943_v22, %v1943_v22  ;;  %1965 = vst [vmem:[#allocation2 + $0x16] sm:$0x1] %v1951_v6  ;;  %2511 = vst.sshfl [vmem:[#allocation2 + $0x2e] sm:$0x1 pattern:$0x73625140] %v1922_v18 }
 0x2a9   :  { %2521 = vst.sshfl [vmem:[#allocation2 + $0x7] sm:$0x1 pattern:$0x73625140] %v2162_v24  ;;  %v2171_v3 = vcombine.high %v2169_v30, %v2169_v30  ;;  %v2185_v19 = vrot.slane %v2169_v30, %v3605_v5  ;;  %v2192_v52 = vrot.slane %v2170_v43, %v3605_v5  ;;  %v2200_v2 = vcombine.high %v2178_v4, %v2178_v4 }
 0x2aa   :  { %v1954_v17 = vcombine.high %v1950_v57, %v1950_v57  ;;  %1966 = vst [vmem:[#allocation2 + $0x1e] sm:$0x1] %v1953_v28  ;;  %1969 = vst [vmem:[#allocation2 + $0x36] sm:$0x1] %v1952_v20 }
 0x2ab   :  { %2522 = vst.sshfl [vmem:[#allocation2 + $0xf] sm:$0x1 pattern:$0x73625140] %v2170_v43  ;;  %v2199_v29 = vrot.slane %v2171_v3, %v3605_v5  ;;  %v2201_v31 = vcombine.high %v2185_v19, %v2185_v19  ;;  %v2202_v32 = vcombine.high %v2192_v52, %v2192_v52  ;;  %2214 = vst [vmem:[#allocation2 + $0x17] sm:$0x1] %v2200_v2 }
 0x2ac   :  { %2523 = vst.sshfl [vmem:[#allocation2 + $0x27] sm:$0x1 pattern:$0x73625140] %v2169_v30  ;;  %1970 = vst [vmem:[#allocation2 + $0x3e] sm:$0x1] %v1954_v17 }
 0x2ad   :  { %2524 = vst.sshfl [vmem:[#allocation2 + $0x2f] sm:$0x1 pattern:$0x73625140] %v2171_v3  ;;  %v2203_v35 = vcombine.high %v2199_v29, %v2199_v29  ;;  %2215 = vst [vmem:[#allocation2 + $0x1f] sm:$0x1] %v2202_v32 }
 0x2ae   :  { %2218 = vst [vmem:[#allocation2 + $0x37] sm:$0x1] %v2201_v31 }
 0x2af   :  { %2219 = vst [vmem:[#allocation2 + $0x3f] sm:$0x1] %v2203_v35 }
 0x2b0   :  { %v2228_v13 = vld [vmem:[#allocation2] sm:$0xff] }
 0x2b1   :  { %v2233_v15 = vsel %vm2232_vm8, %v2228_v13, -1e+30  }
 0x2b2 LB: > { %s2999_s4 = smov 1   ;;  %s3000_s5 = smov 2   ;;  %s2985_s3 = sphi %s3663_s3, %s2239_s3   ;;  %v2981_v15 = vphi %v2233_v15, %v3760_v15  }
 0x2b3   : > { %2248 = vrot.lane.b32.xlu0 %v2981_v15, %s2999_s4  ;;  %s3674_s23 = sshll.u32 %s2985_s3, 2  ;;  %s2239_s3 = sadd.s32 1, %s2985_s3  }
 0x2b4   : > { %s2242_s25 = sadd.s32 1, %s3674_s23  ;;  %s2275_s29 = sadd.s32 2, %s3674_s23 }
 0x2b5   : > { %p2243_p4 = scmp.lt.s32.totalorder %s2242_s25, 7  ;;  %v2272_v21 = vstv %s2242_s25  ;;  %p2276_p5 = scmp.lt.s32.totalorder %s2275_s29, 7  ;;  %v2305_v28 = vstv %s2275_s29 }
 0x2b6   : > { %vm2273_vm9 = vcmp.lt.s32.totalorder %v2272_v21, %v3100_v1  ;;  %vm2306_vm11 = vcmp.lt.s32.totalorder %v2305_v28, %v3100_v1  ;;  %s2308_s9 = sadd.s32 3, %s3674_s23  ;;  %s2341_s11 = sadd.s32 4, %s3674_s23 }
 0x2b7   : > { %2251 = vrot.lane.b32.xlu0 %v2981_v15, %s3000_s5  ;;  %s2244_s26 = scalar_select %p2243_p4, %s2242_s25, 7 }
 0x2b8   : > { %s2277_s30 = scalar_select %p2276_p5, %s2275_s29, 7 }
 0x2b9   : > { %s2526_s27 = sshll.u32 %s2244_s26, 3  ;;  %p2309_p6 = scmp.lt.s32.totalorder %s2308_s9, 7 }
 0x2ba   : > { %s2246_s28 = scalar_lea.vmem [#allocation2], %s2526_s27  ;;  %s2527_s7 = sshll.u32 %s2277_s30, 3 }
 0x2bb   : > { %v2247_v55 = vld [vmem:[%s2246_s28] sm:$0xff]  ;;  %s2279_s8 = scalar_lea.vmem [#allocation2], %s2527_s7  ;;  %p2342_p7 = scmp.lt.s32.totalorder %s2341_s11, 7 }
 0x2bc   : > { %v2280_v20 = vld [vmem:[%s2279_s8] sm:$0xff]  ;;  %s2310_s0 = scalar_select %p2309_p6, %s2308_s9, 7 }
 0x2bd   : > { %s2343_s12 = scalar_select %p2342_p7, %s2341_s11, 7 }
 0x2be   : > { %s2528_s24 = sshll.u32 %s2310_s0, 3  ;;  %p2236_p8 = scmp.ge.s32.totalorder %s2239_s3, 2  }
 0x2bf   : > { %s2312_s10 = scalar_lea.vmem [#allocation2], %s2528_s24  ;;  %s2529_s13 = sshll.u32 %s2343_s12, 3 }
 0x2c0   : > { %s2345_s14 = scalar_lea.vmem [#allocation2], %s2529_s13  ;;  %s3001_s15 = smov (%p2236_p8), [#allocation11]  }
 0x2c1   :  { %s2394_s16 = sshll.u32 (%p2236_p8), %s3001_s15, 4  ;;  %s2395_s16 = int_to_ptr.vmem [resolvable:$true] %s2394_s16 }
 0x2c2   :  { %s2941_s17 = scalar_lea.vmem (%p2236_p8), %s2395_s16, 128  ;;  %p2946_p10 = scmp.lt.s32.totalorder (%p2236_p8), %s2395_s16, %s2395_s16 }
 0x2c3   :  { %p2942_p9 = scmp.ne.s32.totalorder (%p2236_p8), %s2395_s16, %s2941_s17  ;;  %p2947_p11 = scmp.lt.s32.totalorder (%p2236_p8), %s2941_s17, %s2941_s17 }
 0x2c5   :  { %p2948_p12 = por (%p2236_p8), %p2947_p11, %p2946_p10 }
 0x2c7   :  { %p2949_p13 = pnand (%p2236_p8), %p2948_p12, %p2942_p9 }
 0x325   : > { %v2249_v5 = vpop.permute.xlu0 %2248 }
 0x326   : > { %v2250_v33 = vadd.f32 %v2249_v5, %v3602_v26 }
 0x328   : > { %v2254_v36 = vmax.f32 %v2981_v15, %v2250_v33 }
 0x329   : > { %v2252_v58 = vpop.permute.xlu0 %2251 }
 0x32a   : > { %v2253_v40 = vadd.f32 %v2252_v58, %v3095_v0 }
 0x32c   : > { %v2255_v37 = vmax.f32 %v2254_v36, %v2253_v40 }
 0x32e   : > { %v2256_v41 = vsub.f32 %v2981_v15, %v2255_v37  ;;  %v2259_v45 = vsub.f32 %v2250_v33, %v2255_v37  ;;  %v2263_v44 = vsub.f32 %v2253_v40, %v2255_v37 }
 0x330   : > { %v2257_v59 = vmul.f32 1.442695, %v2256_v41  ;;  %v2260_v46 = vmul.f32 1.442695, %v2259_v45  ;;  %v2264_v53 = vmul.f32 1.442695, %v2263_v44 }
 0x332   : > { %2817 = vpow2.f32 %v2257_v59  ;;  %v2313_v59 = vld [vmem:[%s2312_s10] sm:$0xff] }
 0x333   : > { %2819 = vpow2.f32 %v2260_v46  ;;  %v2338_v46 = vstv %s2308_s9 }
 0x334   : > { %2821 = vpow2.f32 %v2264_v53  ;;  %vm2339_vm12 = vcmp.lt.s32.totalorder %v2338_v46, %v3100_v1 }
 0x33c   : > { %v2818_v47 = vpop.eup %2817 }
 0x33d   : > { %v2820_v7 = vpop.eup %2819 }
 0x33e   : > { %v2262_v14 = vadd.f32 %v2820_v7, %v2818_v47  ;;  %v2822_v8 = vpop.eup %2821 }
 0x340   : > { %v2266_v34 = vadd.f32 %v2822_v8, %v2262_v14 }
 0x342   : > { %2823 = vlog2.f32 %v2266_v34 }
 0x34c   : > { %v2824_v38 = vpop.eup %2823 }
 0x34d   : > { %v2268_v9 = vmul.f32 0.6931472, %v2824_v38 }
 0x34f   : > { %v2269_v48 = vadd.f32 %v2268_v9, %v2255_v37 }
 0x351   : > { %v2270_v50 = vadd.f32 %v2269_v48, %v2247_v55 }
 0x353   : > { %v2271_v60 = vsel %vm2225_vm2, %v2270_v50, -1e+30 }
 0x354   : > { %v2274_v51 = vsel %vm2273_vm9, %v2271_v60, %v2981_v15 }
 0x355   : > { %2281 = vrot.lane.b32.xlu1 %v2274_v51, %s2999_s4 }
 0x359   : > { %2284 = vrot.lane.b32.xlu1 %v2274_v51, %s3000_s5 }
 0x3c7   : > { %v2282_v54 = vpop.permute.xlu1 %2281 }
 0x3c8   : > { %v2283_v39 = vadd.f32 %v2282_v54, %v3602_v26 }
 0x3ca   : > { %v2287_v10 = vmax.f32 %v2274_v51, %v2283_v39 }
 0x3cb   : > { %v2285_v56 = vpop.permute.xlu1 %2284 }
 0x3cc   : > { %v2286_v62 = vadd.f32 %v2285_v56, %v3095_v0 }
 0x3ce   : > { %v2288_v27 = vmax.f32 %v2287_v10, %v2286_v62 }
 0x3d0   : > { %v2289_v49 = vsub.f32 %v2274_v51, %v2288_v27  ;;  %v2292_v12 = vsub.f32 %v2283_v39, %v2288_v27  ;;  %v2296_v61 = vsub.f32 %v2286_v62, %v2288_v27 }
 0x3d2   : > { %v2290_v11 = vmul.f32 1.442695, %v2289_v49  ;;  %v2293_v16 = vmul.f32 1.442695, %v2292_v12  ;;  %v2297_v18 = vmul.f32 1.442695, %v2296_v61 }
 0x3d4   : > { %2825 = vpow2.f32 %v2290_v11  ;;  %v2346_v11 = vld [vmem:[%s2345_s14] sm:$0xff] }
 0x3d5   : > { %2827 = vpow2.f32 %v2293_v16  ;;  %v2371_v16 = vstv %s2341_s11 }
 0x3d6   : > { %2829 = vpow2.f32 %v2297_v18  ;;  %vm2372_vm13 = vcmp.lt.s32.totalorder %v2371_v16, %v3100_v1 }
 0x3de   : > { %v2826_v63 = vpop.eup %2825 }
 0x3df   : > { %v2828_v22 = vpop.eup %2827 }
 0x3e0   : > { %v2295_v6 = vadd.f32 %v2828_v22, %v2826_v63  ;;  %v2830_v42 = vpop.eup %2829 }
 0x3e2   : > { %v2299_v23 = vadd.f32 %v2830_v42, %v2295_v6  ;;  %v2374_v42 = vld [vmem:[#allocation9] sm:$0xff] (%p2236_p8) }
 0x3e4   : > { %2831 = vlog2.f32 %v2299_v23 }
 0x3ee   : > { %v2832_v24 = vpop.eup %2831 }
 0x3ef   : > { %v2301_v57 = vmul.f32 0.6931472, %v2832_v24 }
 0x3f1   : > { %v2302_v30 = vadd.f32 %v2301_v57, %v2288_v27 }
 0x3f3   : > { %v2303_v43 = vadd.f32 %v2302_v30, %v2280_v20 }
 0x3f5   : > { %v2304_v4 = vsel %vm2225_vm2, %v2303_v43, -1e+30 }
 0x3f6   : > { %v2307_v17 = vsel %vm2306_vm11, %v2304_v4, %v2274_v51 }
 0x3f7   : > { %2317 = vrot.lane.b32.xlu1 %v2307_v17, %s3000_s5  ;;  %2314 = vrot.lane.b32.xlu0 %v2307_v17, %s2999_s4 }
 0x469   : > { %v2318_v3 = vpop.permute.xlu1 %2317  ;;  %v2315_v19 = vpop.permute.xlu0 %2314 }
 0x46a   : > { %v2316_v52 = vadd.f32 %v2315_v19, %v3602_v26  ;;  %v2319_v2 = vadd.f32 %v2318_v3, %v3095_v0 }
 0x46c   : > { %v2320_v29 = vmax.f32 %v2307_v17, %v2316_v52 }
 0x46e   : > { %v2321_v31 = vmax.f32 %v2320_v29, %v2319_v2 }
 0x470   : > { %v2322_v32 = vsub.f32 %v2307_v17, %v2321_v31  ;;  %v2325_v35 = vsub.f32 %v2316_v52, %v2321_v31  ;;  %v2329_v13 = vsub.f32 %v2319_v2, %v2321_v31 }
 0x472   : > { %v2323_v15 = vmul.f32 1.442695, %v2322_v32  ;;  %v2326_v5 = vmul.f32 1.442695, %v2325_v35  ;;  %v2330_v33 = vmul.f32 1.442695, %v2329_v13 }
 0x474   : > { %2833 = vpow2.f32 %v2323_v15 }
 0x475   : > { %2835 = vpow2.f32 %v2326_v5 }
 0x476   : > { %2837 = vpow2.f32 %v2330_v33 }
 0x47e   : > { %v2834_v58 = vpop.eup %2833 }
 0x47f   : > { %v2836_v36 = vpop.eup %2835 }
 0x480   : > { %v2328_v40 = vadd.f32 %v2836_v36, %v2834_v58  ;;  %v2838_v37 = vpop.eup %2837 }
 0x482   : > { %v2332_v41 = vadd.f32 %v2838_v37, %v2328_v40 }
 0x484   : > { %2839 = vlog2.f32 %v2332_v41 }
 0x48e   : > { %v2840_v45 = vpop.eup %2839 }
 0x48f   : > { %v2334_v44 = vmul.f32 0.6931472, %v2840_v45 }
 0x491   : > { %v2335_v53 = vadd.f32 %v2334_v44, %v2321_v31 }
 0x493   : > { %v2336_v47 = vadd.f32 %v2335_v53, %v2313_v59 }
 0x495   : > { %v2337_v7 = vsel %vm2225_vm2, %v2336_v47, -1e+30 }
 0x496   : > { %v2340_v14 = vsel %vm2339_vm12, %v2337_v7, %v2307_v17 }
 0x497   : > { %2350 = vrot.lane.b32.xlu1 %v2340_v14, %s3000_s5  ;;  %2347 = vrot.lane.b32.xlu0 %v2340_v14, %s2999_s4 }
 0x509   : > { %v2351_v8 = vpop.permute.xlu1 %2350  ;;  %v2348_v34 = vpop.permute.xlu0 %2347 }
 0x50a   : > { %v2349_v38 = vadd.f32 %v2348_v34, %v3602_v26  ;;  %v2352_v9 = vadd.f32 %v2351_v8, %v3095_v0 }
 0x50c   : > { %v2353_v55 = vmax.f32 %v2340_v14, %v2349_v38 }
 0x50e   : > { %v2354_v21 = vmax.f32 %v2353_v55, %v2352_v9 }
 0x510   : > { %v2355_v48 = vsub.f32 %v2340_v14, %v2354_v21  ;;  %v2358_v50 = vsub.f32 %v2349_v38, %v2354_v21  ;;  %v2362_v60 = vsub.f32 %v2352_v9, %v2354_v21 }
 0x512   : > { %v2356_v51 = vmul.f32 1.442695, %v2355_v48  ;;  %v2359_v54 = vmul.f32 1.442695, %v2358_v50  ;;  %v2363_v39 = vmul.f32 1.442695, %v2362_v60 }
 0x514   : > { %2841 = vpow2.f32 %v2356_v51 }
 0x515   : > { %2843 = vpow2.f32 %v2359_v54 }
 0x516   : > { %2845 = vpow2.f32 %v2363_v39 }
 0x51e   : > { %v2842_v56 = vpop.eup %2841 }
 0x51f   : > { %v2844_v10 = vpop.eup %2843 }
 0x520   : > { %v2361_v62 = vadd.f32 %v2844_v10, %v2842_v56  ;;  %v2846_v27 = vpop.eup %2845 }
 0x522   : > { %v2365_v49 = vadd.f32 %v2846_v27, %v2361_v62 }
 0x524   : > { %2847 = vlog2.f32 %v2365_v49 }
 0x52e   : > { %v2848_v12 = vpop.eup %2847 }
 0x52f   : > { %v2367_v61 = vmul.f32 0.6931472, %v2848_v12 }
 0x531   : > { %v2368_v18 = vadd.f32 %v2367_v61, %v2354_v21  ;;  %2238 = sbr.rel (!%p2236_p8) target bundleno = 690 (0x2b2), region = 71 }
 0x533   : > { %v2369_v63 = vadd.f32 %v2368_v18, %v2346_v11 }
 0x535   : > { %v2370_v22 = vsel %vm2225_vm2, %v2369_v63, -1e+30 }
 0x536   : > { %v2373_v6 = vsel %vm2372_vm13, %v2370_v22, %v2340_v14  }
 0x537   : > { %v3760_v15 = vmov %v2373_v6  ;;  %v2375_v23 = vadd.f32 (%p2236_p8), %v2374_v42, %v2373_v6 }
 0x539   :  { %2376 = vmax.xlane.f32.xlu0 %v2375_v23 }
 0x5c6   :  { %v2377_v24 = vpop.xlane.xlu0 %2376 }
 0x5c7   :  { %v2378_v57 = vsub.f32 %v2375_v23, %v2377_v24 }
 0x5c9   :  { %v2379_v20 = vmul.f32 1.442695, %v2378_v57 }
 0x5cb   :  { %2849 = vpow2.f32 %v2379_v20 }
 0x5d5   :  { %v2850_v28 = vpop.eup %2849 }
 0x5d6   :  { %2381 = vadd.xlane.f32.xlu0 %v2850_v28 }
 0x663   :  { %v2382_v30 = vpop.xlane.xlu0 %2381 }
 0x664   :  { %2851 = vlog2.f32 %v2382_v30 }
 0x66e   :  { %v2852_v43 = vpop.eup %2851 }
 0x66f   :  { %v2384_v4 = vmul.f32 0.6931472, %v2852_v43 }
 0x671   :  { %v2385_v17 = vadd.f32 %v2384_v4, %v2377_v24 }
 0x673   :  { %v2386_v3 = vsub.f32 0.0, %v2385_v17 }
 0x675   :  { %2387 = vst [vmem:[#allocation11] sm:$0xff] %v2386_v3 }
 0x676   :  { %2952 = shalt.err (!%p2949_p13)
}
 0x677   :  { %s2953_s1 = scalar_lea.hbm %s3727_s6, 128 }
 0x678   :  { %p2954_p0 = scmp.ne.s32.totalorder %s3727_s6, %s2953_s1  ;;  %p2957_p1 = scmp.lt.u32.totalorder %s2953_s1, %s3727_s6 }
 0x67a   :  { %p2959_p2 = pnand %p2957_p1, %p2954_p0 }
 0x67c   :  { %2962 = shalt.err (!%p2959_p2)
}
 0x67d   :  { %2397 = dma.vmem_to_hbm [thread:$0]  %s2395_s16, 128, %s3727_s6, [#allocation5]  }
 0x67e   :  { %2977 = dma.done.wait [#allocation5], 128  }
 0x67f   :  { %2978 = vsyncadd [#allocation5], 4294967168 }
 0x680   :  { %2401 = vsyncpa [#allocation4], 1 }
 0x681   :  { %2402 = vsyncpa [#allocation7], 1 }
 0x682   :  { %2403 = vsyncpa [#allocation10], 1 }
 0x683   :  { %2404 = vsyncpa [#allocation5], 1 }

</bundles_post_ra>
